<compile_context>
chip_gen: v5e
topology: v5e:2x2
jax: 0.10.0
libtpu: 0.0.40
codegen_flags: <defaults>
</compile_context>

<pallas_src>
import functools
import math

import jax
import jax.numpy as jnp
from jax.experimental import pallas as pl
from jax.experimental.pallas import tpu as pltpu


def ff_kernel(x_ref, w1_ref, b1_ref, w2_ref, b2_ref, o_ref, *scratch,
              tk, resident, single):
    k = pl.program_id(1)

    if resident and not single:
        # Weights live fully in VMEM; select this step's hidden slice in-kernel.
        off = pl.multiple_of(k * tk, tk)
        w1_t = w1_ref[:, pl.ds(off, tk)]
        b1_t = b1_ref[:, pl.ds(off, tk)]
        w2_t = w2_ref[pl.ds(off, tk), :]
    else:
        w1_t = w1_ref[...]
        b1_t = b1_ref[...]
        w2_t = w2_ref[...]

    # First linear (hidden slice) + bias + ReLU, f32 accumulation on the MXU.
    h = jnp.dot(x_ref[...], w1_t, preferred_element_type=jnp.float32)
    h = jnp.maximum(h + b1_t, 0.0)                      # (tm, tk) + (1, tk)

    # Dropout(0.1) -> identity (eval mode).
    # Second linear: partial (tm, d_model) contribution for this hidden slice.
    part = jnp.dot(h.astype(w2_t.dtype), w2_t, preferred_element_type=jnp.float32)

    if single:
        # hidden fits in one tile: no accumulator RMW needed.
        o_ref[...] = (part + b2_ref[...]).astype(o_ref.dtype)
    else:
        acc_ref = scratch[0]

        @pl.when(k == 0)
        def _():
            acc_ref[...] = jnp.zeros_like(acc_ref)

        acc_ref[...] += part

        @pl.when(k == pl.num_programs(1) - 1)
        def _():
            o_ref[...] = (acc_ref[...] + b2_ref[...]).astype(o_ref.dtype)


def _round_up(a, b):
    return (a + b - 1) // b * b


def _vmem_budget_bytes():
    """Usable VMEM for this generation (physical capacity minus headroom)."""
    cap = 64 * 1024 * 1024                      # conservative default (v7x-sized)
    try:
        info = pltpu.get_tpu_info()
        cap = int(getattr(info, "vmem_capacity_bytes", cap)) or cap
    except Exception:
        pass
    # Headroom for compiler-internal scratch / semaphores:
    #   128 MiB (v5e/v6e) -> ~112 MiB usable;  64 MiB (v7x) -> ~51 MiB usable.
    return max(cap - 16 * 1024 * 1024, int(cap * 0.8))


def _pick_hidden_tile(hidden, target):
    """Largest 128-aligned divisor of `hidden` that is <= target (lane-aligned
    so the streamed weight BlockSpecs satisfy the (8,128) rule).  Falls back to
    the full hidden dim if no aligned divisor exists."""
    best = None
    d = 128
    lim = min(target, hidden)
    while d <= lim:
        if hidden % d == 0:
            best = d
        d += 128
    return best if best is not None else hidden


def _vmem_estimate(tm, tk, d_model, hidden, resident, single,
                   x_bytes, w_bytes, o_bytes):
    est = 2 * tm * d_model * x_bytes            # x tile (double-buffered)
    est += 2 * tm * d_model * o_bytes           # out tile (double-buffered)
    if not single:
        est += tm * d_model * 4                 # f32 accumulator scratch
    est += tm * tk * 4                          # live f32 h intermediate
    if resident:
        est += 2 * (2 * d_model * hidden + hidden + d_model) * w_bytes
    else:
        est += 2 * (2 * d_model * tk + tk + d_model) * w_bytes
    return est


def feed_forward(x, w1, b1, w2, b2, *, compute_dtype=None,
                 tm=None, tk=None, force_stream=False):
    """x: [B, S, d_model]; returns [B, S, d_model].

    Weights pre-transposed vs PyTorch: w1 [d_model, hidden], w2 [hidden, d_model].
    """
    B, S, d_model = x.shape
    hidden = w1.shape[1]
    M = B * S
    out_dtype = x.dtype

    # Optional bf16 MXU path (biggest compute lever on v6e/v7x, halves HBM
    # bytes).  Accumulation stays f32 in-kernel; output cast back to x dtype.
    if compute_dtype is not None:
        x = x.astype(compute_dtype)
        w1 = w1.astype(compute_dtype)
        w2 = w2.astype(compute_dtype)

    x_bytes = x.dtype.itemsize
    w_bytes = w1.dtype.itemsize
    o_bytes = jnp.dtype(out_dtype).itemsize

    budget = _vmem_budget_bytes()
    MXU_ROWS = 256                               # MXU-height-friendly row unit

    # ---- hidden (reduction) tile --------------------------------------------
    if tk is None:
        tk_target = 2048 if budget > 64 * 1024 * 1024 else 1024
        tk = _pick_hidden_tile(hidden, tk_target)
    assert hidden % tk == 0, "hidden tile tk must divide hidden"
    n_k = hidden // tk
    single = n_k == 1

    # ---- weights resident in VMEM? -------------------------------------------
    # If both weights fit (double-buffered) in the budget, pass them as
    # full-array blocks with a constant index_map -> DMA'd from HBM once per
    # call instead of once per row tile.
    resident = (not force_stream) and (
        _vmem_estimate(MXU_ROWS, tk, d_model, hidden, True, single,
                       x_bytes, w_bytes, o_bytes) <= budget)

    # ---- row tile -------------------------------------------------------------
    if tm is None:
        tm_cap = min(2048, _round_up(M, MXU_ROWS))
        tm = MXU_ROWS
        t = MXU_ROWS
        while t <= tm_cap:
            if _vmem_estimate(t, tk, d_model, hidden, resident, single,
                              x_bytes, w_bytes, o_bytes) <= budget:
                tm = t
            t += MXU_ROWS
        # Keep >= 2 row tiles when there are enough real rows so both v7x
        # TensorCores ("parallel" axis 0) get work.
        if M >= 2 * 128:
            while tm > 128 and (M + tm - 1) // tm < 2:
                tm //= 2
    tm = max(8, _round_up(tm, 8))

    # Pad rows so the grid is exact; padded rows are dropped after the call.
    M_pad = _round_up(M, tm)
    x2 = x.reshape(M, d_model)
    if M_pad != M:
        x2 = jnp.pad(x2, ((0, M_pad - M), (0, 0)))

    b1_2d = b1.reshape(1, hidden)
    b2_2d = b2.reshape(1, d_model)

    n_i = M_pad // tm
    grid = (n_i, n_k)

    if resident:
        w1_spec = pl.BlockSpec((d_model, hidden), lambda i, k: (0, 0))
        b1_spec = pl.BlockSpec((1, hidden),       lambda i, k: (0, 0))
        w2_spec = pl.BlockSpec((hidden, d_model), lambda i, k: (0, 0))
    else:
        # NOTE: pipeline_mode=pl.Buffered(3) on these two is worth a sweep on
        # v5e / f32 weights, at the cost of one extra weight tile of VMEM.
        w1_spec = pl.BlockSpec((d_model, tk), lambda i, k: (0, k))
        b1_spec = pl.BlockSpec((1, tk),       lambda i, k: (0, k))
        w2_spec = pl.BlockSpec((tk, d_model), lambda i, k: (k, 0))
    b2_spec = pl.BlockSpec((1, d_model), lambda i, k: (0, 0))

    scratch = [] if single else [pltpu.VMEM((tm, d_model), jnp.float32)]

    # Accurate VMEM request (no double-counted buffering) + small headroom.
    est = _vmem_estimate(tm, tk, d_model, hidden, resident, single,
                         x_bytes, w_bytes, o_bytes)
    vmem_limit = int(min(budget, max(est + 4 * 1024 * 1024, 16 * 1024 * 1024)))

    # Cost estimate: two matmuls (2*M*K*N each); weights are re-streamed once
    # per row tile unless resident.
    flops = 4 * M_pad * d_model * hidden
    weight_bytes = (w1.size * w1.dtype.itemsize + b1.size * b1.dtype.itemsize
                    + w2.size * w2.dtype.itemsize + b2.size * b2.dtype.itemsize)
    weight_streams = 1 if resident else n_i
    bytes_accessed = int(M_pad * d_model * x_bytes
                         + weight_streams * weight_bytes
                         + M_pad * d_model * o_bytes)

    kernel = functools.partial(ff_kernel, tk=tk, resident=resident, single=single)

    out2 = pl.pallas_call(
        kernel,
        out_shape=jax.ShapeDtypeStruct((M_pad, d_model), out_dtype),
        grid_spec=pltpu.PrefetchScalarGridSpec(
            num_scalar_prefetch=0,
            grid=grid,
            in_specs=[
                pl.BlockSpec((tm, d_model), lambda i, k: (i, 0)),   # x rows
                w1_spec, b1_spec, w2_spec, b2_spec,
            ],
            out_specs=pl.BlockSpec((tm, d_model), lambda i, k: (i, 0)),
            scratch_shapes=scratch,
        ),
        compiler_params=pltpu.CompilerParams(
            dimension_semantics=("parallel", "arbitrary"),
            vmem_limit_bytes=vmem_limit,
        ),
        cost_estimate=pl.CostEstimate(
            flops=flops, transcendentals=0, bytes_accessed=bytes_accessed),
    )(x2, w1, b1_2d, w2, b2_2d)

    return out2[:M].reshape(B, S, d_model)


def init_params(key, d_model, d_exp=4, dtype=jnp.float32):
    """Deterministic init mimicking nn.Linear's uniform(-1/sqrt(fan_in), ...)."""
    hidden = d_model * d_exp
    k1, k2, k3, k4 = jax.random.split(key, 4)
    bound1 = 1.0 / math.sqrt(d_model)
    bound2 = 1.0 / math.sqrt(hidden)
    # Stored pre-transposed relative to PyTorch's (out_features, in_features).
    w1 = jax.random.uniform(k1, (d_model, hidden), dtype, -bound1, bound1)
    b1 = jax.random.uniform(k2, (hidden,), dtype, -bound1, bound1)
    w2 = jax.random.uniform(k3, (hidden, d_model), dtype, -bound2, bound2)
    b2 = jax.random.uniform(k4, (d_model,), dtype, -bound2, bound2)
    return w1, b1, w2, b2


if __name__ == "__main__":
    key = jax.random.PRNGKey(0)
    kx, kp, kx2 = jax.random.split(key, 3)

    # Case 1: module-sized small shapes (d_model multiple of 128 keeps output
    # stores lane-dense).  Exercises the resident-weight, single-hidden-tile path.
    B, S, d_model, d_exp = 2, 8, 128, 4
    x = jax.random.normal(kx, (B, S, d_model), jnp.float32)
    w1, b1, w2, b2 = init_params(kp, d_model, d_exp)

    out = jax.block_until_ready(feed_forward(x, w1, b1, w2, b2))
    ref = jnp.maximum(x @ w1 + b1, 0.0) @ w2 + b2
    assert out.shape == (B, S, d_model)
    assert jnp.allclose(out, ref, atol=1e-4, rtol=1e-4), "case 1 mismatch"

    # Case 2: exercise the streamed-weight + f32 accumulator path, multiple
    # row tiles and row padding (M = 320 -> two 256-row tiles after padding).
    B2, S2 = 4, 80
    x_b = jax.random.normal(kx2, (B2, S2, d_model), jnp.float32)
    out_b = jax.block_until_ready(
        feed_forward(x_b, w1, b1, w2, b2, tk=128, force_stream=True))
    ref_b = jnp.maximum(x_b @ w1 + b1, 0.0) @ w2 + b2
    assert out_b.shape == (B2, S2, d_model)
    assert jnp.allclose(out_b, ref_b, atol=1e-4, rtol=1e-4), "case 2 mismatch"

    print("KERNEL_OK")
</pallas_src>

<mosaic_0001>
module attributes {stable_mosaic.version = 11 : i64} {
  func.func @ff_kernel(%arg0: i32, %arg1: i32, %arg2: memref<256x128xf32, #tpu.memory_space<vmem>>, %arg3: memref<128x512xf32, #tpu.memory_space<vmem>>, %arg4: memref<1x512xf32, #tpu.memory_space<vmem>>, %arg5: memref<512x128xf32, #tpu.memory_space<vmem>>, %arg6: memref<1x128xf32, #tpu.memory_space<vmem>>, %arg7: memref<256x128xf32, #tpu.memory_space<vmem>>) attributes {dimension_semantics = [#tpu.dimension_semantics<parallel>, #tpu.dimension_semantics<arbitrary>], iteration_bounds = array<i64: 1, 1>, scalar_prefetch = 0 : i64, scratch_operands = 0 : i64, tpu.core_type = #tpu.core_type<tc>, window_params = [{transform_indices = @transform_0, window_bounds = array<i64: 256, 128>}, {pipeline_mode = #tpu.pipeline_mode<synchronous>, transform_indices = @transform_1, window_bounds = array<i64: 128, 512>}, {pipeline_mode = #tpu.pipeline_mode<synchronous>, transform_indices = @transform_2, window_bounds = array<i64: 1, 512>}, {pipeline_mode = #tpu.pipeline_mode<synchronous>, transform_indices = @transform_3, window_bounds = array<i64: 512, 128>}, {pipeline_mode = #tpu.pipeline_mode<synchronous>, transform_indices = @transform_4, window_bounds = array<i64: 1, 128>}, {transform_indices = @transform_5, window_bounds = array<i64: 256, 128>}]} {
    %c0 = arith.constant 0 : index
    %c0_0 = arith.constant 0 : index
    %0 = vector.load %arg3[%c0, %c0_0] : memref<128x512xf32, #tpu.memory_space<vmem>>, vector<128x512xf32>
    %c0_1 = arith.constant 0 : index
    %c0_2 = arith.constant 0 : index
    %1 = vector.load %arg4[%c0_1, %c0_2] : memref<1x512xf32, #tpu.memory_space<vmem>>, vector<1x512xf32>
    %c0_3 = arith.constant 0 : index
    %c0_4 = arith.constant 0 : index
    %2 = vector.load %arg5[%c0_3, %c0_4] : memref<512x128xf32, #tpu.memory_space<vmem>>, vector<512x128xf32>
    %c0_5 = arith.constant 0 : index
    %c0_6 = arith.constant 0 : index
    %3 = vector.load %arg2[%c0_5, %c0_6] : memref<256x128xf32, #tpu.memory_space<vmem>>, vector<256x128xf32>
    %cst = arith.constant dense<0.000000e+00> : vector<256x512xf32>
    %4 = tpu.matmul %3, %0, %cst {dimension_numbers = #tpu.dot_dimension_numbers<[1], [0], [0], [1], [0, 0, 1, 1], [], []>} : vector<256x128xf32>, vector<128x512xf32>, vector<256x512xf32> -> vector<256x512xf32>
    %5 = vector.broadcast %1 : vector<1x512xf32> to vector<256x512xf32>
    %6 = arith.addf %4, %5 : vector<256x512xf32>
    %cst_7 = arith.constant 0.000000e+00 : f32
    %7 = vector.broadcast %cst_7 : f32 to vector<256x512xf32>
    %8 = arith.maximumf %6, %7 : vector<256x512xf32>
    %cst_8 = arith.constant dense<0.000000e+00> : vector<256x128xf32>
    %9 = tpu.matmul %8, %2, %cst_8 {dimension_numbers = #tpu.dot_dimension_numbers<[1], [0], [0], [1], [0, 0, 1, 1], [], []>} : vector<256x512xf32>, vector<512x128xf32>, vector<256x128xf32> -> vector<256x128xf32>
    %c0_9 = arith.constant 0 : index
    %c0_10 = arith.constant 0 : index
    %10 = vector.load %arg6[%c0_9, %c0_10] : memref<1x128xf32, #tpu.memory_space<vmem>>, vector<1x128xf32>
    %11 = vector.broadcast %10 : vector<1x128xf32> to vector<256x128xf32>
    %12 = arith.addf %9, %11 : vector<256x128xf32>
    %c0_11 = arith.constant 0 : index
    %c0_12 = arith.constant 0 : index
    %13 = vector.load %arg7[%c0_11, %c0_12] : memref<256x128xf32, #tpu.memory_space<vmem>>, vector<256x128xf32>
    tpu.vector_store %arg7[%c0_11, %c0_12], %12 {strides = array<i32>} : memref<256x128xf32, #tpu.memory_space<vmem>>, vector<256x128xf32>,
    return
  }
  func.func @transform_0(%arg0: i32, %arg1: i32) -> (i32, i32) {
    %c0_i32 = arith.constant 0 : i32
    %c0_i32_0 = arith.constant 0 : i32
    return %arg0, %c0_i32 : i32, i32
  }
  func.func @transform_1(%arg0: i32, %arg1: i32) -> (i32, i32) {
    %c0_i32 = arith.constant 0 : i32
    %c0_i32_0 = arith.constant 0 : i32
    %c0_i32_1 = arith.constant 0 : i32
    return %c0_i32, %c0_i32_0 : i32, i32
  }
  func.func @transform_2(%arg0: i32, %arg1: i32) -> (i32, i32) {
    %c0_i32 = arith.constant 0 : i32
    %c0_i32_0 = arith.constant 0 : i32
    %c0_i32_1 = arith.constant 0 : i32
    return %c0_i32, %c0_i32_0 : i32, i32
  }
  func.func @transform_3(%arg0: i32, %arg1: i32) -> (i32, i32) {
    %c0_i32 = arith.constant 0 : i32
    %c0_i32_0 = arith.constant 0 : i32
    %c0_i32_1 = arith.constant 0 : i32
    return %c0_i32, %c0_i32_0 : i32, i32
  }
  func.func @transform_4(%arg0: i32, %arg1: i32) -> (i32, i32) {
    %c0_i32 = arith.constant 0 : i32
    %c0_i32_0 = arith.constant 0 : i32
    %c0_i32_1 = arith.constant 0 : i32
    return %c0_i32, %c0_i32_0 : i32, i32
  }
  func.func @transform_5(%arg0: i32, %arg1: i32) -> (i32, i32) {
    %c0_i32 = arith.constant 0 : i32
    %c0_i32_0 = arith.constant 0 : i32
    return %arg0, %c0_i32 : i32, i32
  }
}

</mosaic_0001>

<bundles_post_ra>
// kernel: tpu_custom_call.1
= control target key start
LH: loop header
LB: loop body
LE: loop exit
PB: predicated region body
PF: predicated region fallthrough
CT: control target
= control target key end

     0   :  { %10 = vsyncpa [#allocation3], 0  ;;  %s2099_s0 = inlined_call_operand.hbm [shape: f32[256,128], index: 0, kind: input, shape index: {}]   ;;  %s2100_s1 = inlined_call_operand.hbm [shape: f32[128,512], index: 1, kind: input, shape index: {}]   ;;  %s2101_s2 = inlined_call_operand.hbm [shape: f32[1,512], index: 2, kind: input, shape index: {}]   ;;  %s2102_s3 = inlined_call_operand.hbm [shape: f32[512,128], index: 3, kind: input, shape index: {}]   ;;  %s2103_s4 = inlined_call_operand.vmem [shape: f32[1,128], index: 4, kind: input, shape index: {}]   ;;  %s2104_s5 = inlined_call_operand.hbm [shape: f32[256,128], index: 5, kind: output, shape index: {}]  }
   0x1   :  { %11 = vsyncpa [#allocation6], 0 }
   0x2   :  { %12 = vsyncpa [#allocation9], 0  ;;  %s31_s20 = sshll.u32 %s2100_s1, 4  ;;  %s32_s20 = int_to_ptr.hbm [resolvable:$true] %s31_s20 }
   0x3   :  { %13 = vsyncpa [#allocation4], 0  ;;  %s1479_s21 = smov [#allocation5]   ;;  %s18_s25 = sshll.u32 %s2099_s0, 4  ;;  %s19_s25 = int_to_ptr.hbm [resolvable:$true] %s18_s25 }
   0x4   :  { %s33_s22 = sshll.u32 %s1479_s21, 4  ;;  %s1480_s26 = smov 512   ;;  %s34_s22 = int_to_ptr.vmem [resolvable:$true] %s33_s22 }
   0x5   :  { %s1481_s27 = smov 32   ;;  %s1482_s28 = smov [#allocation2]  }
   0x6   :  { %39 = dma.hbm_to_vmem [thread:$0]  %s32_s20, 8192, %s34_s22, [#allocation6], %s1480_s26, %s1480_s26, %s1481_s27  }
   0x7   :  { %s20_s29 = sshll.u32 %s1482_s28, 4  ;;  %s1483_s30 = smov 128   ;;  %s21_s29 = int_to_ptr.vmem [resolvable:$true] %s20_s29 }
   0x8   :  { %s1484_s6 = smov 8   ;;  %s45_s8 = sshll.u32 %s2101_s2, 4  ;;  %s46_s8 = int_to_ptr.hbm [resolvable:$true] %s45_s8 }
   0x9   :  { %26 = dma.hbm_to_vmem [thread:$0]  %s19_s25, 4096, %s21_s29, [#allocation3], %s1483_s30, %s1483_s30, %s1484_s6  }
   0xa   :  { %s1485_s9 = smov [#allocation7]   ;;  %s55_s12 = sshll.u32 %s2102_s3, 4  ;;  %s56_s12 = int_to_ptr.hbm [resolvable:$true] %s55_s12 }
   0xb   :  { %s47_s0 = sshll.u32 %s1485_s9, 4  ;;  %s1486_s13 = smov [#allocation8]   ;;  %s48_s0 = int_to_ptr.vmem [resolvable:$true] %s47_s0 }
   0xc   :  { %50 = dma.hbm_to_vmem [thread:$0]  %s46_s8, 64, %s48_s0, [#allocation6]  }
   0xd   :  { %s57_s14 = sshll.u32 %s1486_s13, 4  ;;  %s58_s14 = int_to_ptr.vmem [resolvable:$true] %s57_s14 }
   0xe   :  { %63 = dma.hbm_to_vmem [thread:$0]  %s56_s12, 8192, %s58_s14, [#allocation9], %s1483_s30, %s1483_s30, %s1484_s6  }
   0xf   :  { %1471 = dma.done.wait [#allocation3], 4096  }
  0x10   :  { %1472 = vsyncadd [#allocation3], 4294963200 }
  0x11   :  { %1473 = dma.done.wait [#allocation6], 8256  }
  0x12   :  { %1474 = vsyncadd [#allocation6], 4294959040 }
  0x13   :  { %1475 = dma.done.wait [#allocation9], 8192  }
  0x14   :  { %1476 = vsyncadd [#allocation9], 4294959104  ;;  %v142_v0 = vld [vmem:[#allocation5 + $0x1e0] sm:$0xff]  ;;  %v143_v1 = vld [vmem:[#allocation5 + $0x1e8] sm:$0xff]  ;;  %s1326_s18 = sshll.u32 %s2104_s5, 4  ;;  %s1327_s18 = int_to_ptr.hbm [resolvable:$true] %s1326_s18 }
  0x15   :  { %v144_v2 = vld [vmem:[#allocation5 + $0x1f0] sm:$0xff]  ;;  %252 = vmatpush.msra.mxu0 %v142_v0  ;;  %365 = vmatpush.msra.mxu1 %v143_v1  ;;  %v145_v3 = vld [vmem:[#allocation5 + $0x1f8] sm:$0xff]  ;;  %v138_v4 = vld [vmem:[#allocation5 + $0x1c0] sm:$0xff] }
  0x16   :  { %v139_v5 = vld [vmem:[#allocation5 + $0x1c8] sm:$0xff]  ;;  %478 = vmatpush.msra.mxu2 %v144_v2  ;;  %591 = vmatpush.msra.mxu3 %v145_v3  ;;  %v140_v6 = vld [vmem:[#allocation5 + $0x1d0] sm:$0xff]  ;;  %v141_v7 = vld [vmem:[#allocation5 + $0x1d8] sm:$0xff] }
  0x17   :  { %v134_v8 = vld [vmem:[#allocation5 + $0x1a0] sm:$0xff]  ;;  %253 = vmatpush.msra.mxu0 %v138_v4  ;;  %366 = vmatpush.msra.mxu1 %v139_v5  ;;  %v135_v9 = vld [vmem:[#allocation5 + $0x1a8] sm:$0xff]  ;;  %v136_v10 = vld [vmem:[#allocation5 + $0x1b0] sm:$0xff] }
  0x18   :  { %v137_v11 = vld [vmem:[#allocation5 + $0x1b8] sm:$0xff]  ;;  %479 = vmatpush.msra.mxu2 %v140_v6  ;;  %592 = vmatpush.msra.mxu3 %v141_v7  ;;  %v130_v12 = vld [vmem:[#allocation5 + $0x180] sm:$0xff]  ;;  %v131_v13 = vld [vmem:[#allocation5 + $0x188] sm:$0xff] }
  0x19   :  { %254 = vmatpush.msra.mxu0 %v134_v8  ;;  %367 = vmatpush.msra.mxu1 %v135_v9  ;;  %v132_v14 = vld [vmem:[#allocation5 + $0x190] sm:$0xff]  ;;  %v133_v15 = vld [vmem:[#allocation5 + $0x198] sm:$0xff]  ;;  %v126_v16 = vld [vmem:[#allocation5 + $0x160] sm:$0xff] }
  0x1a   :  { %480 = vmatpush.msra.mxu2 %v136_v10  ;;  %593 = vmatpush.msra.mxu3 %v137_v11  ;;  %v127_v17 = vld [vmem:[#allocation5 + $0x168] sm:$0xff]  ;;  %v128_v18 = vld [vmem:[#allocation5 + $0x170] sm:$0xff]  ;;  %v129_v19 = vld [vmem:[#allocation5 + $0x178] sm:$0xff] }
  0x1b   :  { %255 = vmatpush.msra.mxu0 %v130_v12  ;;  %368 = vmatpush.msra.mxu1 %v131_v13  ;;  %v122_v20 = vld [vmem:[#allocation5 + $0x140] sm:$0xff]  ;;  %v123_v21 = vld [vmem:[#allocation5 + $0x148] sm:$0xff]  ;;  %v124_v22 = vld [vmem:[#allocation5 + $0x150] sm:$0xff] }
  0x1c   :  { %481 = vmatpush.msra.mxu2 %v132_v14  ;;  %594 = vmatpush.msra.mxu3 %v133_v15  ;;  %v125_v23 = vld [vmem:[#allocation5 + $0x158] sm:$0xff]  ;;  %v118_v24 = vld [vmem:[#allocation5 + $0x120] sm:$0xff]  ;;  %v119_v25 = vld [vmem:[#allocation5 + $0x128] sm:$0xff] }
  0x1d   :  { %256 = vmatpush.msra.mxu0 %v126_v16  ;;  %369 = vmatpush.msra.mxu1 %v127_v17  ;;  %v120_v26 = vld [vmem:[#allocation5 + $0x130] sm:$0xff]  ;;  %v121_v27 = vld [vmem:[#allocation5 + $0x138] sm:$0xff]  ;;  %v114_v28 = vld [vmem:[#allocation5 + $0x100] sm:$0xff] }
  0x1e   :  { %482 = vmatpush.msra.mxu2 %v128_v18  ;;  %595 = vmatpush.msra.mxu3 %v129_v19  ;;  %v115_v29 = vld [vmem:[#allocation5 + $0x108] sm:$0xff]  ;;  %v116_v30 = vld [vmem:[#allocation5 + $0x110] sm:$0xff]  ;;  %v117_v31 = vld [vmem:[#allocation5 + $0x118] sm:$0xff] }
  0x1f   :  { %257 = vmatpush.msra.mxu0 %v122_v20  ;;  %370 = vmatpush.msra.mxu1 %v123_v21  ;;  %v110_v32 = vld [vmem:[#allocation5 + $0xe0] sm:$0xff]  ;;  %v111_v33 = vld [vmem:[#allocation5 + $0xe8] sm:$0xff]  ;;  %v112_v34 = vld [vmem:[#allocation5 + $0xf0] sm:$0xff] }
  0x20   :  { %483 = vmatpush.msra.mxu2 %v124_v22  ;;  %596 = vmatpush.msra.mxu3 %v125_v23  ;;  %v113_v35 = vld [vmem:[#allocation5 + $0xf8] sm:$0xff]  ;;  %v106_v36 = vld [vmem:[#allocation5 + $0xc0] sm:$0xff]  ;;  %v107_v37 = vld [vmem:[#allocation5 + $0xc8] sm:$0xff] }
  0x21   :  { %258 = vmatpush.msra.mxu0 %v118_v24  ;;  %371 = vmatpush.msra.mxu1 %v119_v25  ;;  %v108_v38 = vld [vmem:[#allocation5 + $0xd0] sm:$0xff]  ;;  %v109_v39 = vld [vmem:[#allocation5 + $0xd8] sm:$0xff]  ;;  %v102_v40 = vld [vmem:[#allocation5 + $0xa0] sm:$0xff] }
  0x22   :  { %484 = vmatpush.msra.mxu2 %v120_v26  ;;  %597 = vmatpush.msra.mxu3 %v121_v27  ;;  %v103_v41 = vld [vmem:[#allocation5 + $0xa8] sm:$0xff]  ;;  %v104_v42 = vld [vmem:[#allocation5 + $0xb0] sm:$0xff]  ;;  %v105_v43 = vld [vmem:[#allocation5 + $0xb8] sm:$0xff] }
  0x23   :  { %259 = vmatpush.msra.mxu0 %v114_v28  ;;  %372 = vmatpush.msra.mxu1 %v115_v29  ;;  %v98_v44 = vld [vmem:[#allocation5 + $0x80] sm:$0xff]  ;;  %v99_v45 = vld [vmem:[#allocation5 + $0x88] sm:$0xff]  ;;  %v100_v46 = vld [vmem:[#allocation5 + $0x90] sm:$0xff] }
  0x24   :  { %485 = vmatpush.msra.mxu2 %v116_v30  ;;  %598 = vmatpush.msra.mxu3 %v117_v31  ;;  %v101_v47 = vld [vmem:[#allocation5 + $0x98] sm:$0xff]  ;;  %v94_v48 = vld [vmem:[#allocation5 + $0x60] sm:$0xff]  ;;  %v95_v49 = vld [vmem:[#allocation5 + $0x68] sm:$0xff] }
  0x25   :  { %260 = vmatpush.msra.mxu0 %v110_v32  ;;  %373 = vmatpush.msra.mxu1 %v111_v33  ;;  %v96_v50 = vld [vmem:[#allocation5 + $0x70] sm:$0xff]  ;;  %v97_v51 = vld [vmem:[#allocation5 + $0x78] sm:$0xff]  ;;  %v90_v52 = vld [vmem:[#allocation5 + $0x40] sm:$0xff] }
  0x26   :  { %486 = vmatpush.msra.mxu2 %v112_v34  ;;  %599 = vmatpush.msra.mxu3 %v113_v35  ;;  %v91_v53 = vld [vmem:[#allocation5 + $0x48] sm:$0xff]  ;;  %v92_v54 = vld [vmem:[#allocation5 + $0x50] sm:$0xff]  ;;  %v93_v55 = vld [vmem:[#allocation5 + $0x58] sm:$0xff] }
  0x27   :  { %261 = vmatpush.msra.mxu0 %v106_v36  ;;  %374 = vmatpush.msra.mxu1 %v107_v37  ;;  %v86_v56 = vld [vmem:[#allocation5 + $0x20] sm:$0xff]  ;;  %v87_v57 = vld [vmem:[#allocation5 + $0x28] sm:$0xff]  ;;  %v88_v58 = vld [vmem:[#allocation5 + $0x30] sm:$0xff] }
  0x28   :  { %487 = vmatpush.msra.mxu2 %v108_v38  ;;  %600 = vmatpush.msra.mxu3 %v109_v39  ;;  %v89_v59 = vld [vmem:[#allocation5 + $0x38] sm:$0xff]  ;;  %v82_v60 = vld [vmem:[#allocation5] sm:$0xff]  ;;  %v83_v61 = vld [vmem:[#allocation5 + $0x8] sm:$0xff] }
  0x29   :  { %262 = vmatpush.msra.mxu0 %v102_v40  ;;  %375 = vmatpush.msra.mxu1 %v103_v41  ;;  %v84_v62 = vld [vmem:[#allocation5 + $0x10] sm:$0xff]  ;;  %v85_v63 = vld [vmem:[#allocation5 + $0x18] sm:$0xff]  ;;  %v211_v0 = vld [vmem:[#allocation2] sm:$0xff] }
  0x2a   :  { %488 = vmatpush.msra.mxu2 %v104_v42  ;;  %601 = vmatpush.msra.mxu3 %v105_v43  ;;  %v194_v1 = vld [vmem:[#allocation8 + $0x178] sm:$0xff]  ;;  %v193_v5 = vld [vmem:[#allocation8 + $0x170] sm:$0xff]  ;;  %v192_v9 = vld [vmem:[#allocation8 + $0x168] sm:$0xff] }
  0x2b   :  { %263 = vmatpush.msra.mxu0 %v98_v44  ;;  %376 = vmatpush.msra.mxu1 %v99_v45  ;;  %v162_v2 = vld [vmem:[#allocation8 + $0x78] sm:$0xff]  ;;  %v161_v6 = vld [vmem:[#allocation8 + $0x70] sm:$0xff]  ;;  %v160_v10 = vld [vmem:[#allocation8 + $0x68] sm:$0xff] }
  0x2c   :  { %489 = vmatpush.msra.mxu2 %v100_v46  ;;  %602 = vmatpush.msra.mxu3 %v101_v47  ;;  %v210_v3 = vld [vmem:[#allocation8 + $0x1f8] sm:$0xff]  ;;  %v209_v7 = vld [vmem:[#allocation8 + $0x1f0] sm:$0xff]  ;;  %v208_v11 = vld [vmem:[#allocation8 + $0x1e8] sm:$0xff] }
  0x2d   :  { %264 = vmatpush.msra.mxu0 %v94_v48  ;;  %377 = vmatpush.msra.mxu1 %v95_v49  ;;  %v178_v4 = vld [vmem:[#allocation8 + $0xf8] sm:$0xff]  ;;  %v177_v8 = vld [vmem:[#allocation8 + $0xf0] sm:$0xff]  ;;  %v176_v12 = vld [vmem:[#allocation8 + $0xe8] sm:$0xff] }
  0x2e   :  { %490 = vmatpush.msra.mxu2 %v96_v50  ;;  %603 = vmatpush.msra.mxu3 %v97_v51  ;;  %v212_v13 = vld [vmem:[#allocation2 + $0x8] sm:$0xff]  ;;  %v213_v14 = vld [vmem:[#allocation2 + $0x10] sm:$0xff]  ;;  %v214_v19 = vld [vmem:[#allocation2 + $0x18] sm:$0xff] }
  0x2f   :  { %265 = vmatpush.msra.mxu0 %v90_v52  ;;  %378 = vmatpush.msra.mxu1 %v91_v53  ;;  %v191_v15 = vld [vmem:[#allocation8 + $0x160] sm:$0xff]  ;;  %v190_v21 = vld [vmem:[#allocation8 + $0x158] sm:$0xff]  ;;  %v217_v26 = vld [vmem:[#allocation2 + $0x30] sm:$0xff] }
  0x30   :  { %491 = vmatpush.msra.mxu2 %v92_v54  ;;  %604 = vmatpush.msra.mxu3 %v93_v55  ;;  %v159_v16 = vld [vmem:[#allocation8 + $0x60] sm:$0xff]  ;;  %v158_v22 = vld [vmem:[#allocation8 + $0x58] sm:$0xff]  ;;  %v189_v27 = vld [vmem:[#allocation8 + $0x150] sm:$0xff] }
  0x31   :  { %266 = vmatpush.msra.mxu0 %v86_v56  ;;  %379 = vmatpush.msra.mxu1 %v87_v57  ;;  %v207_v17 = vld [vmem:[#allocation8 + $0x1e0] sm:$0xff]  ;;  %v206_v23 = vld [vmem:[#allocation8 + $0x1d8] sm:$0xff]  ;;  %v157_v28 = vld [vmem:[#allocation8 + $0x50] sm:$0xff] }
  0x32   :  { %492 = vmatpush.msra.mxu2 %v88_v58  ;;  %605 = vmatpush.msra.mxu3 %v89_v59  ;;  %v175_v18 = vld [vmem:[#allocation8 + $0xe0] sm:$0xff]  ;;  %v174_v24 = vld [vmem:[#allocation8 + $0xd8] sm:$0xff]  ;;  %v205_v29 = vld [vmem:[#allocation8 + $0x1d0] sm:$0xff] }
  0x33   :  { %267 = vmatpush.msra.mxu0 %v82_v60  ;;  %380 = vmatpush.msra.mxu1 %v83_v61  ;;  %v215_v20 = vld [vmem:[#allocation2 + $0x20] sm:$0xff]  ;;  %v216_v25 = vld [vmem:[#allocation2 + $0x28] sm:$0xff]  ;;  %v173_v30 = vld [vmem:[#allocation8 + $0xd0] sm:$0xff] }
  0x34   :  { %493 = vmatpush.msra.mxu2 %v84_v62  ;;  %606 = vmatpush.msra.mxu3 %v85_v63  ;;  %v218_v31 = vld [vmem:[#allocation2 + $0x38] sm:$0xff]  ;;  %v219_v32 = vld [vmem:[#allocation2 + $0x40] sm:$0xff]  ;;  %v188_v33 = vld [vmem:[#allocation8 + $0x148] sm:$0xff] }
  0x35   :  { %268 = vmatmul.f32.vlgmr.msra.gmra.mxu0 %v211_v0  ;;  %381 = vmatmul.f32.vlgmr.msra.gmra.mxu1 %v211_v0  ;;  %v156_v34 = vld [vmem:[#allocation8 + $0x48] sm:$0xff]  ;;  %v187_v39 = vld [vmem:[#allocation8 + $0x140] sm:$0xff]  ;;  %v222_v43 = vld [vmem:[#allocation2 + $0x58] sm:$0xff] }
  0x36   :  { %494 = vmatmul.f32.vlgmr.msra.gmra.mxu2 %v211_v0  ;;  %607 = vmatmul.f32.vlgmr.msra.gmra.mxu3 %v211_v0  ;;  %v204_v35 = vld [vmem:[#allocation8 + $0x1c8] sm:$0xff]  ;;  %v155_v40 = vld [vmem:[#allocation8 + $0x40] sm:$0xff]  ;;  %v186_v45 = vld [vmem:[#allocation8 + $0x138] sm:$0xff] }
  0x37   :  { %1062 = vmatpush.msrb.mxu2 %v194_v1  ;;  %836 = vmatpush.msrb.mxu0 %v162_v2  ;;  %v172_v36 = vld [vmem:[#allocation8 + $0xc8] sm:$0xff]  ;;  %v203_v41 = vld [vmem:[#allocation8 + $0x1c0] sm:$0xff]  ;;  %v154_v46 = vld [vmem:[#allocation8 + $0x38] sm:$0xff] }
  0x38   :  { %1175 = vmatpush.msrb.mxu3 %v210_v3  ;;  %949 = vmatpush.msrb.mxu1 %v178_v4  ;;  %v220_v37 = vld [vmem:[#allocation2 + $0x48] sm:$0xff]  ;;  %v221_v38 = vld [vmem:[#allocation2 + $0x50] sm:$0xff]  ;;  %v223_v44 = vld [vmem:[#allocation2 + $0x60] sm:$0xff] }
  0x39   :  { %1063 = vmatpush.msrb.mxu2 %v193_v5  ;;  %837 = vmatpush.msrb.mxu0 %v161_v6  ;;  %v171_v42 = vld [vmem:[#allocation8 + $0xc0] sm:$0xff]  ;;  %v202_v47 = vld [vmem:[#allocation8 + $0x1b8] sm:$0xff]  ;;  %v225_v50 = vld [vmem:[#allocation2 + $0x70] sm:$0xff] }
  0x3a   :  { %1176 = vmatpush.msrb.mxu3 %v209_v7  ;;  %950 = vmatpush.msrb.mxu1 %v177_v8  ;;  %v224_v48 = vld [vmem:[#allocation2 + $0x68] sm:$0xff]  ;;  %v170_v49 = vld [vmem:[#allocation8 + $0xb8] sm:$0xff]  ;;  %v185_v51 = vld [vmem:[#allocation8 + $0x130] sm:$0xff] }
  0x3b   :  { %1064 = vmatpush.msrb.mxu2 %v192_v9  ;;  %838 = vmatpush.msrb.mxu0 %v160_v10  ;;  %v153_v52 = vld [vmem:[#allocation8 + $0x30] sm:$0xff]  ;;  %v227_v58 = vld [vmem:[#allocation2 + $0x80] sm:$0xff]  ;;  %v184_v59 = vld [vmem:[#allocation8 + $0x128] sm:$0xff] }
  0x3c   :  { %1177 = vmatpush.msrb.mxu3 %v208_v11  ;;  %951 = vmatpush.msrb.mxu1 %v176_v12  ;;  %v201_v53 = vld [vmem:[#allocation8 + $0x1b0] sm:$0xff]  ;;  %v152_v60 = vld [vmem:[#allocation8 + $0x28] sm:$0xff]  ;;  %v183_v9 = vld [vmem:[#allocation8 + $0x120] sm:$0xff] }
  0x3d   :  { %271 = vmatmul.f32.gmra.mxu0 %v212_v13  ;;  %384 = vmatmul.f32.gmra.mxu1 %v212_v13  ;;  %v226_v54 = vld [vmem:[#allocation2 + $0x78] sm:$0xff]  ;;  %v200_v61 = vld [vmem:[#allocation8 + $0x1a8] sm:$0xff]  ;;  %v151_v10 = vld [vmem:[#allocation8 + $0x20] sm:$0xff] }
  0x3e   :  { %497 = vmatmul.f32.gmra.mxu2 %v212_v13  ;;  %610 = vmatmul.f32.gmra.mxu3 %v212_v13  ;;  %v169_v55 = vld [vmem:[#allocation8 + $0xb0] sm:$0xff]  ;;  %v228_v2 = vld [vmem:[#allocation2 + $0x88] sm:$0xff] }
  0x3f   :  { %1065 = vmatpush.msrb.mxu2 %v191_v15  ;;  %839 = vmatpush.msrb.mxu0 %v159_v16  ;;  %v168_v3 = vld [vmem:[#allocation8 + $0xa8] sm:$0xff]  ;;  %v199_v11 = vld [vmem:[#allocation8 + $0x1a0] sm:$0xff]  ;;  %v230_v16 = vld [vmem:[#allocation2 + $0x98] sm:$0xff] }
  0x40   :  { %1178 = vmatpush.msrb.mxu3 %v207_v17  ;;  %952 = vmatpush.msrb.mxu1 %v175_v18  ;;  %v229_v8 = vld [vmem:[#allocation2 + $0x90] sm:$0xff]  ;;  %v167_v17 = vld [vmem:[#allocation8 + $0xa0] sm:$0xff] }
  0x41   :  { %1066 = vmatpush.msrb.mxu2 %v190_v21  ;;  %840 = vmatpush.msrb.mxu0 %v158_v22  ;;  %v231_v22 = vld [vmem:[#allocation2 + $0xa0] sm:$0xff] }
  0x42   :  { %1179 = vmatpush.msrb.mxu3 %v206_v23  ;;  %953 = vmatpush.msrb.mxu1 %v174_v24  ;;  %v182_v23 = vld [vmem:[#allocation8 + $0x118] sm:$0xff] }
  0x43   :  { %1067 = vmatpush.msrb.mxu2 %v189_v27  ;;  %841 = vmatpush.msrb.mxu0 %v157_v28  ;;  %v150_v24 = vld [vmem:[#allocation8 + $0x18] sm:$0xff] }
  0x44   :  { %1180 = vmatpush.msrb.mxu3 %v205_v29  ;;  %954 = vmatpush.msrb.mxu1 %v173_v30  ;;  %v232_v30 = vld [vmem:[#allocation2 + $0xa8] sm:$0xff] }
  0x45   :  { %274 = vmatmul.f32.gmra.mxu0 %v213_v14  ;;  %387 = vmatmul.f32.gmra.mxu1 %v213_v14 }
  0x46   :  { %500 = vmatmul.f32.gmra.mxu2 %v213_v14  ;;  %613 = vmatmul.f32.gmra.mxu3 %v213_v14 }
  0x47   :  { %1068 = vmatpush.msrb.mxu2 %v188_v33  ;;  %842 = vmatpush.msrb.mxu0 %v156_v34 }
  0x48   :  { %1181 = vmatpush.msrb.mxu3 %v204_v35  ;;  %955 = vmatpush.msrb.mxu1 %v172_v36  ;;  %v233_v36 = vld [vmem:[#allocation2 + $0xb0] sm:$0xff] }
  0x49   :  { %1069 = vmatpush.msrb.mxu2 %v187_v39  ;;  %843 = vmatpush.msrb.mxu0 %v155_v40  ;;  %v197_v39 = vld [vmem:[#allocation8 + $0x190] sm:$0xff] }
  0x4a   :  { %1182 = vmatpush.msrb.mxu3 %v203_v41  ;;  %956 = vmatpush.msrb.mxu1 %v171_v42 }
  0x4b   :  { %1070 = vmatpush.msrb.mxu2 %v186_v45  ;;  %844 = vmatpush.msrb.mxu0 %v154_v46  ;;  %v165_v45 = vld [vmem:[#allocation8 + $0x90] sm:$0xff] }
  0x4c   :  { %1183 = vmatpush.msrb.mxu3 %v202_v47  ;;  %957 = vmatpush.msrb.mxu1 %v170_v49 }
  0x4d   :  { %277 = vmatmul.f32.gmra.mxu0 %v214_v19  ;;  %390 = vmatmul.f32.gmra.mxu1 %v214_v19 }
  0x4e   :  { %503 = vmatmul.f32.gmra.mxu2 %v214_v19  ;;  %616 = vmatmul.f32.gmra.mxu3 %v214_v19 }
  0x4f   :  { %1071 = vmatpush.msrb.mxu2 %v185_v51  ;;  %845 = vmatpush.msrb.mxu0 %v153_v52  ;;  %v180_v51 = vld [vmem:[#allocation8 + $0x108] sm:$0xff] }
  0x50   :  { %1184 = vmatpush.msrb.mxu3 %v201_v53  ;;  %958 = vmatpush.msrb.mxu1 %v169_v55  ;;  %v148_v52 = vld [vmem:[#allocation8 + $0x8] sm:$0xff] }
  0x51   :  { %1072 = vmatpush.msrb.mxu2 %v184_v59  ;;  %846 = vmatpush.msrb.mxu0 %v152_v60  ;;  %v196_v53 = vld [vmem:[#allocation8 + $0x188] sm:$0xff] }
  0x52   :  { %1185 = vmatpush.msrb.mxu3 %v200_v61  ;;  %959 = vmatpush.msrb.mxu1 %v168_v3  ;;  %v236_v60 = vld [vmem:[#allocation2 + $0xc8] sm:$0xff] }
  0x53   :  { %1073 = vmatpush.msrb.mxu2 %v183_v9  ;;  %847 = vmatpush.msrb.mxu0 %v151_v10  ;;  %v164_v61 = vld [vmem:[#allocation8 + $0x88] sm:$0xff] }
  0x54   :  { %1186 = vmatpush.msrb.mxu3 %v199_v11  ;;  %960 = vmatpush.msrb.mxu1 %v167_v17  ;;  %v237_v10 = vld [vmem:[#allocation2 + $0xd0] sm:$0xff]  ;;  %v179_v11 = vld [vmem:[#allocation8 + $0x100] sm:$0xff] }
  0x55   :  { %280 = vmatmul.f32.gmra.mxu0 %v215_v20  ;;  %393 = vmatmul.f32.gmra.mxu1 %v215_v20  ;;  %v195_v17 = vld [vmem:[#allocation8 + $0x180] sm:$0xff] }
  0x56   :  { %506 = vmatmul.f32.gmra.mxu2 %v215_v20  ;;  %619 = vmatmul.f32.gmra.mxu3 %v215_v20 }
  0x57   :  { %1074 = vmatpush.msrb.mxu2 %v182_v23  ;;  %848 = vmatpush.msrb.mxu0 %v150_v24 }
  0x5d   :  { %283 = vmatmul.f32.gmra.mxu0 %v216_v25  ;;  %396 = vmatmul.f32.gmra.mxu1 %v216_v25 }
  0x5e   :  { %509 = vmatmul.f32.gmra.mxu2 %v216_v25  ;;  %622 = vmatmul.f32.gmra.mxu3 %v216_v25  ;;  %v198_v25 = vld [vmem:[#allocation8 + $0x198] sm:$0xff] }
  0x5f   :  { %1187 = vmatpush.msrb.mxu3 %v198_v25 }
  0x61   :  { %1188 = vmatpush.msrb.mxu3 %v197_v39 }
  0x63   :  { %1189 = vmatpush.msrb.mxu3 %v196_v53  ;;  %v240_v53 = vld [vmem:[#allocation2 + $0xe8] sm:$0xff] }
  0x65   :  { %286 = vmatmul.f32.gmra.mxu0 %v217_v26  ;;  %399 = vmatmul.f32.gmra.mxu1 %v217_v26 }
  0x66   :  { %512 = vmatmul.f32.gmra.mxu2 %v217_v26  ;;  %625 = vmatmul.f32.gmra.mxu3 %v217_v26 }
  0x67   :  { %1190 = vmatpush.msrb.mxu3 %v195_v17  ;;  %v146_v17 = vld [vmem:[#allocation7] sm:$0xf] }
  0x6d   :  { %289 = vmatmul.f32.gmra.mxu0 %v218_v31  ;;  %402 = vmatmul.f32.gmra.mxu1 %v218_v31 }
  0x6e   :  { %515 = vmatmul.f32.gmra.mxu2 %v218_v31  ;;  %628 = vmatmul.f32.gmra.mxu3 %v218_v31  ;;  %v166_v31 = vld [vmem:[#allocation8 + $0x98] sm:$0xff] }
  0x6f   :  { %961 = vmatpush.msrb.mxu1 %v166_v31  ;;  %v163_v31 = vld [vmem:[#allocation8 + $0x80] sm:$0xff] }
  0x71   :  { %962 = vmatpush.msrb.mxu1 %v165_v45 }
  0x73   :  { %963 = vmatpush.msrb.mxu1 %v164_v61 }
  0x75   :  { %292 = vmatmul.f32.gmra.mxu0 %v219_v32  ;;  %405 = vmatmul.f32.gmra.mxu1 %v219_v32 }
  0x76   :  { %518 = vmatmul.f32.gmra.mxu2 %v219_v32  ;;  %631 = vmatmul.f32.gmra.mxu3 %v219_v32 }
  0x77   :  { %964 = vmatpush.msrb.mxu1 %v163_v31 }
  0x7d   :  { %295 = vmatmul.f32.gmra.mxu0 %v220_v37  ;;  %408 = vmatmul.f32.gmra.mxu1 %v220_v37 }
  0x7e   :  { %521 = vmatmul.f32.gmra.mxu2 %v220_v37  ;;  %634 = vmatmul.f32.gmra.mxu3 %v220_v37  ;;  %v181_v37 = vld [vmem:[#allocation8 + $0x110] sm:$0xff] }
  0x7f   :  { %1075 = vmatpush.msrb.mxu2 %v181_v37 }
  0x81   :  { %1076 = vmatpush.msrb.mxu2 %v180_v51 }
  0x83   :  { %1077 = vmatpush.msrb.mxu2 %v179_v11 }
  0x85   :  { %298 = vmatmul.f32.gmra.mxu0 %v221_v38  ;;  %411 = vmatmul.f32.gmra.mxu1 %v221_v38 }
  0x86   :  { %524 = vmatmul.f32.gmra.mxu2 %v221_v38  ;;  %637 = vmatmul.f32.gmra.mxu3 %v221_v38  ;;  %v149_v38 = vld [vmem:[#allocation8 + $0x10] sm:$0xff] }
  0x87   :  { %849 = vmatpush.msrb.mxu0 %v149_v38 }
  0x89   :  { %850 = vmatpush.msrb.mxu0 %v148_v52 }
  0x8d   :  { %301 = vmatmul.f32.gmra.mxu0 %v222_v43  ;;  %414 = vmatmul.f32.gmra.mxu1 %v222_v43 }
  0x8e   :  { %527 = vmatmul.f32.gmra.mxu2 %v222_v43  ;;  %640 = vmatmul.f32.gmra.mxu3 %v222_v43 }
  0x95   :  { %304 = vmatmul.f32.gmra.mxu0 %v223_v44  ;;  %417 = vmatmul.f32.gmra.mxu1 %v223_v44 }
  0x96   :  { %530 = vmatmul.f32.gmra.mxu2 %v223_v44  ;;  %643 = vmatmul.f32.gmra.mxu3 %v223_v44  ;;  %v234_v44 = vld [vmem:[#allocation2 + $0xb8] sm:$0xff] }
  0x9d   :  { %307 = vmatmul.f32.gmra.mxu0 %v224_v48  ;;  %420 = vmatmul.f32.gmra.mxu1 %v224_v48 }
  0x9e   :  { %533 = vmatmul.f32.gmra.mxu2 %v224_v48  ;;  %646 = vmatmul.f32.gmra.mxu3 %v224_v48 }
  0xa5   :  { %310 = vmatmul.f32.gmra.mxu0 %v225_v50  ;;  %423 = vmatmul.f32.gmra.mxu1 %v225_v50 }
  0xa6   :  { %536 = vmatmul.f32.gmra.mxu2 %v225_v50  ;;  %649 = vmatmul.f32.gmra.mxu3 %v225_v50  ;;  %v235_v50 = vld [vmem:[#allocation2 + $0xc0] sm:$0xff] }
  0xad   :  { %313 = vmatmul.f32.gmra.mxu0 %v226_v54  ;;  %426 = vmatmul.f32.gmra.mxu1 %v226_v54 }
  0xae   :  { %539 = vmatmul.f32.gmra.mxu2 %v226_v54  ;;  %652 = vmatmul.f32.gmra.mxu3 %v226_v54 }
  0xb2   :  { %v1536_v56 = vpop.f32.mrf.mxu0  ;;  %v1538_v57 = vpop.f32.mrf.mxu1 }
  0xb5   :  { %316 = vmatmul.f32.gmra.mxu0 %v227_v58  ;;  %429 = vmatmul.f32.gmra.mxu1 %v227_v58 }
  0xb6   :  { %542 = vmatmul.f32.gmra.mxu2 %v227_v58  ;;  %655 = vmatmul.f32.gmra.mxu3 %v227_v58 }
  0xb9   :  { %v1540_v62 = vpop.f32.mrf.mxu2  ;;  %v1542_v63 = vpop.f32.mrf.mxu3 }
  0xba   :  { %v1544_v0 = vpop.f32.mrf.mxu0  ;;  %v1546_v1 = vpop.f32.mrf.mxu1 }
  0xbd   :  { %319 = vmatmul.f32.gmra.mxu0 %v228_v2  ;;  %432 = vmatmul.f32.gmra.mxu1 %v228_v2 }
  0xbe   :  { %545 = vmatmul.f32.gmra.mxu2 %v228_v2  ;;  %658 = vmatmul.f32.gmra.mxu3 %v228_v2 }
  0xc1   :  { %v1548_v4 = vpop.f32.mrf.mxu2  ;;  %v1550_v5 = vpop.f32.mrf.mxu3 }
  0xc2   :  { %v1552_v6 = vpop.f32.mrf.mxu0  ;;  %v1554_v7 = vpop.f32.mrf.mxu1 }
  0xc5   :  { %322 = vmatmul.f32.gmra.mxu0 %v229_v8  ;;  %435 = vmatmul.f32.gmra.mxu1 %v229_v8 }
  0xc6   :  { %548 = vmatmul.f32.gmra.mxu2 %v229_v8  ;;  %661 = vmatmul.f32.gmra.mxu3 %v229_v8 }
  0xc9   :  { %v1556_v12 = vpop.f32.mrf.mxu2  ;;  %v1558_v13 = vpop.f32.mrf.mxu3 }
  0xca   :  { %v1560_v14 = vpop.f32.mrf.mxu0  ;;  %v1562_v15 = vpop.f32.mrf.mxu1 }
  0xcd   :  { %325 = vmatmul.f32.gmra.mxu0 %v230_v16  ;;  %438 = vmatmul.f32.gmra.mxu1 %v230_v16 }
  0xce   :  { %551 = vmatmul.f32.gmra.mxu2 %v230_v16  ;;  %664 = vmatmul.f32.gmra.mxu3 %v230_v16  ;;  %v147_v16 = vld [vmem:[#allocation8] sm:$0xff] }
  0xcf   :  { %851 = vmatpush.msrb.mxu0 %v147_v16  ;;  %v241_v16 = vld [vmem:[#allocation2 + $0xf0] sm:$0xff] }
  0xd1   :  { %v1564_v18 = vpop.f32.mrf.mxu2  ;;  %v1566_v19 = vpop.f32.mrf.mxu3 }
  0xd2   :  { %v1568_v20 = vpop.f32.mrf.mxu0  ;;  %v1570_v21 = vpop.f32.mrf.mxu1 }
  0xd5   :  { %328 = vmatmul.f32.gmra.mxu0 %v231_v22  ;;  %441 = vmatmul.f32.gmra.mxu1 %v231_v22 }
  0xd6   :  { %554 = vmatmul.f32.gmra.mxu2 %v231_v22  ;;  %667 = vmatmul.f32.gmra.mxu3 %v231_v22 }
  0xd9   :  { %v1572_v26 = vpop.f32.mrf.mxu2  ;;  %v1574_v27 = vpop.f32.mrf.mxu3 }
  0xda   :  { %v1576_v28 = vpop.f32.mrf.mxu0  ;;  %v1578_v29 = vpop.f32.mrf.mxu1 }
  0xdd   :  { %331 = vmatmul.f32.gmra.mxu0 %v232_v30  ;;  %444 = vmatmul.f32.gmra.mxu1 %v232_v30 }
  0xde   :  { %557 = vmatmul.f32.gmra.mxu2 %v232_v30  ;;  %670 = vmatmul.f32.gmra.mxu3 %v232_v30  ;;  %v238_v30 = vld [vmem:[#allocation2 + $0xd8] sm:$0xff] }
  0xe1   :  { %v1580_v32 = vpop.f32.mrf.mxu2  ;;  %v1582_v33 = vpop.f32.mrf.mxu3 }
  0xe2   :  { %v1584_v34 = vpop.f32.mrf.mxu0  ;;  %v1586_v35 = vpop.f32.mrf.mxu1 }
  0xe5   :  { %334 = vmatmul.f32.gmra.mxu0 %v233_v36  ;;  %447 = vmatmul.f32.gmra.mxu1 %v233_v36 }
  0xe6   :  { %560 = vmatmul.f32.gmra.mxu2 %v233_v36  ;;  %673 = vmatmul.f32.gmra.mxu3 %v233_v36 }
  0xe9   :  { %v1588_v40 = vpop.f32.mrf.mxu2  ;;  %v1590_v41 = vpop.f32.mrf.mxu3 }
  0xea   :  { %v1592_v42 = vpop.f32.mrf.mxu0  ;;  %v1594_v43 = vpop.f32.mrf.mxu1 }
  0xed   :  { %337 = vmatmul.f32.gmra.mxu0 %v234_v44  ;;  %450 = vmatmul.f32.gmra.mxu1 %v234_v44 }
  0xee   :  { %563 = vmatmul.f32.gmra.mxu2 %v234_v44  ;;  %676 = vmatmul.f32.gmra.mxu3 %v234_v44  ;;  %v239_v44 = vld [vmem:[#allocation2 + $0xe0] sm:$0xff] }
  0xf1   :  { %v1596_v46 = vpop.f32.mrf.mxu2  ;;  %v1598_v47 = vpop.f32.mrf.mxu3 }
  0xf2   :  { %v1600_v48 = vpop.f32.mrf.mxu0  ;;  %v1602_v49 = vpop.f32.mrf.mxu1 }
  0xf5   :  { %340 = vmatmul.f32.gmra.mxu0 %v235_v50  ;;  %453 = vmatmul.f32.gmra.mxu1 %v235_v50 }
  0xf6   :  { %566 = vmatmul.f32.gmra.mxu2 %v235_v50  ;;  %679 = vmatmul.f32.gmra.mxu3 %v235_v50 }
  0xf9   :  { %v1604_v54 = vpop.f32.mrf.mxu2  ;;  %v1606_v55 = vpop.f32.mrf.mxu3 }
  0xfa   :  { %v1608_v58 = vpop.f32.mrf.mxu0  ;;  %v1610_v59 = vpop.f32.mrf.mxu1 }
  0xfd   :  { %343 = vmatmul.f32.gmra.mxu0 %v236_v60  ;;  %456 = vmatmul.f32.gmra.mxu1 %v236_v60 }
  0xfe   :  { %569 = vmatmul.f32.gmra.mxu2 %v236_v60  ;;  %682 = vmatmul.f32.gmra.mxu3 %v236_v60 }
 0x101   :  { %v1612_v2 = vpop.f32.mrf.mxu2  ;;  %v1614_v3 = vpop.f32.mrf.mxu3 }
 0x102   :  { %v1616_v8 = vpop.f32.mrf.mxu0  ;;  %v1618_v9 = vpop.f32.mrf.mxu1 }
 0x105   :  { %346 = vmatmul.f32.gmra.mxu0 %v237_v10  ;;  %459 = vmatmul.f32.gmra.mxu1 %v237_v10 }
 0x106   :  { %572 = vmatmul.f32.gmra.mxu2 %v237_v10  ;;  %685 = vmatmul.f32.gmra.mxu3 %v237_v10 }
 0x109   :  { %v1620_v22 = vpop.f32.mrf.mxu2  ;;  %v1622_v23 = vpop.f32.mrf.mxu3 }
 0x10a   :  { %v1624_v24 = vpop.f32.mrf.mxu0  ;;  %v1626_v25 = vpop.f32.mrf.mxu1 }
 0x10d   :  { %349 = vmatmul.f32.gmra.mxu0 %v238_v30  ;;  %462 = vmatmul.f32.gmra.mxu1 %v238_v30 }
 0x10e   :  { %575 = vmatmul.f32.gmra.mxu2 %v238_v30  ;;  %688 = vmatmul.f32.gmra.mxu3 %v238_v30 }
 0x111   :  { %v1628_v36 = vpop.f32.mrf.mxu2  ;;  %v1630_v37 = vpop.f32.mrf.mxu3 }
 0x112   :  { %v1632_v38 = vpop.f32.mrf.mxu0  ;;  %v1634_v39 = vpop.f32.mrf.mxu1 }
 0x113   :  { %2105 = vst [vmem:[#allocation15_spill] sm:$0xff] %v1634_v39 }
 0x115   :  { %352 = vmatmul.f32.gmra.mxu0 %v239_v44  ;;  %465 = vmatmul.f32.gmra.mxu1 %v239_v44 }
 0x116   :  { %578 = vmatmul.f32.gmra.mxu2 %v239_v44  ;;  %691 = vmatmul.f32.gmra.mxu3 %v239_v44 }
 0x119   :  { %v1636_v45 = vpop.f32.mrf.mxu2  ;;  %v1638_v50 = vpop.f32.mrf.mxu3 }
 0x11a   :  { %2106 = vst [vmem:[#allocation16_spill] sm:$0xff] %v1636_v45  ;;  %v1640_v51 = vpop.f32.mrf.mxu0  ;;  %v1642_v52 = vpop.f32.mrf.mxu1 }
 0x11b   :  { %2107 = vst [vmem:[#allocation17_spill] sm:$0xff] %v1638_v50 }
 0x11c   :  { %2108 = vst [vmem:[#allocation18_spill] sm:$0xff] %v1640_v51 }
 0x11d   :  { %2109 = vst [vmem:[#allocation19_spill] sm:$0xff] %v1642_v52  ;;  %355 = vmatmul.f32.gmra.mxu0 %v240_v53  ;;  %468 = vmatmul.f32.gmra.mxu1 %v240_v53  ;;  %v1666_v52 = vperm.slane %v146_v17, 3 }
 0x11e   :  { %581 = vmatmul.f32.gmra.mxu2 %v240_v53  ;;  %694 = vmatmul.f32.gmra.mxu3 %v240_v53 }
 0x121   :  { %v1644_v60 = vpop.f32.mrf.mxu2  ;;  %v1646_v61 = vpop.f32.mrf.mxu3 }
 0x122   :  { %2110 = vst [vmem:[#allocation20_spill] sm:$0xff] %v1644_v60  ;;  %v1648_v10 = vpop.f32.mrf.mxu0  ;;  %v1650_v11 = vpop.f32.mrf.mxu1  ;;  %v242_v60 = vld [vmem:[#allocation2 + $0xf8] sm:$0xff] }
 0x123   :  { %2111 = vst [vmem:[#allocation21_spill] sm:$0xff] %v1646_v61  ;;  %v1660_v61 = vperm.slane %v146_v17, 0 }
 0x124   :  { %2112 = vst [vmem:[#allocation22_spill] sm:$0xff] %v1648_v10  ;;  %v1662_v10 = vperm.slane %v146_v17, 1 }
 0x125   :  { %2113 = vst [vmem:[#allocation23_spill] sm:$0xff] %v1650_v11  ;;  %358 = vmatmul.f32.gmra.mxu0 %v241_v16  ;;  %471 = vmatmul.f32.gmra.mxu1 %v241_v16  ;;  %v1664_v11 = vperm.slane %v146_v17, 2 }
 0x126   :  { %584 = vmatmul.f32.gmra.mxu2 %v241_v16  ;;  %697 = vmatmul.f32.gmra.mxu3 %v241_v16  ;;  %v270_v16 = vadd.f32 %v1536_v56, %v1660_v61 }
 0x129   :  { %v1652_v30 = vpop.f32.mrf.mxu2  ;;  %v1654_v31 = vpop.f32.mrf.mxu3 }
 0x12a   :  { %2114 = vst [vmem:[#allocation24_spill] sm:$0xff] %v1652_v30  ;;  %v1656_v44 = vpop.f32.mrf.mxu0  ;;  %v1658_v53 = vpop.f32.mrf.mxu1 }
 0x12b   :  { %2115 = vst [vmem:[#allocation25_spill] sm:$0xff] %v1654_v31  ;;  %v609_v31 = vadd.f32 %v1542_v63, %v1666_v52  ;;  %v499_v63 = vadd.f32 %v1548_v4, %v1664_v11  ;;  %v389_v4 = vadd.f32 %v1554_v7, %v1662_v10  ;;  %v279_v7 = vadd.f32 %v1560_v14, %v1660_v61 }
 0x12c   :  { %2116 = vst [vmem:[#allocation26_spill] sm:$0xff] %v1656_v44  ;;  %v383_v44 = vadd.f32 %v1538_v57, %v1662_v10  ;;  %v273_v57 = vadd.f32 %v1544_v0, %v1660_v61 }
 0x12d   :  { %2117 = vst [vmem:[#allocation27_spill] sm:$0xff] %v1658_v53  ;;  %361 = vmatmul.f32.gmra.mxu0 %v242_v60  ;;  %474 = vmatmul.f32.gmra.mxu1 %v242_v60  ;;  %v496_v53 = vadd.f32 %v1540_v62, %v1664_v11  ;;  %v707_v39 = vmax.f32 %v609_v31, 0.0  ;;  %v386_v62 = vadd.f32 %v1546_v1, %v1662_v10  ;;  %v710_v0 = vmax.f32 %v499_v63, 0.0 }
 0x12e   :  { %587 = vmatmul.f32.gmra.mxu2 %v242_v60  ;;  %700 = vmatmul.f32.gmra.mxu3 %v242_v60  ;;  %v704_v60 = vmax.f32 %v270_v16, 0.0  ;;  %v705_v45 = vmax.f32 %v383_v44, 0.0  ;;  %v276_v1 = vadd.f32 %v1552_v6, %v1660_v61 }
 0x12f   :  { %v706_v56 = vmax.f32 %v496_v53, 0.0  ;;  %v709_v53 = vmax.f32 %v386_v62, 0.0 }
 0x131   :  { %v1676_v30 = vpop.f32.mrf.mxu2  ;;  %v1678_v17 = vpop.f32.mrf.mxu3 }
 0x132   :  { %v1680_v51 = vpop.f32.mrf.mxu0  ;;  %v1682_v50 = vpop.f32.mrf.mxu1 }
 0x133   :  { %2118 = vst [vmem:[#allocation28_spill] sm:$0xff] %v1682_v50  ;;  %v612_v50 = vadd.f32 %v1550_v5, %v1666_v52  ;;  %v502_v5 = vadd.f32 %v1556_v12, %v1664_v11  ;;  %v392_v12 = vadd.f32 %v1562_v15, %v1662_v10  ;;  %v282_v15 = vadd.f32 %v1568_v20, %v1660_v61 }
 0x135   :  { %852 = vmatmul.f32.vlgmr.msrb.gmra.mxu0 %v704_v60  ;;  %965 = vmatmul.f32.vlgmr.msrb.gmra.mxu1 %v705_v45  ;;  %v711_v60 = vmax.f32 %v612_v50, 0.0  ;;  %v714_v6 = vmax.f32 %v502_v5, 0.0 }
 0x136   :  { %1078 = vmatmul.f32.vlgmr.msrb.gmra.mxu2 %v706_v56  ;;  %1191 = vmatmul.f32.vlgmr.msrb.gmra.mxu3 %v707_v39  ;;  %v708_v39 = vmax.f32 %v273_v57, 0.0  ;;  %v615_v56 = vadd.f32 %v1558_v13, %v1666_v52  ;;  %v505_v13 = vadd.f32 %v1564_v18, %v1664_v11  ;;  %v395_v18 = vadd.f32 %v1570_v21, %v1662_v10 }
 0x137   :  { %v285_v21 = vadd.f32 %v1576_v28, %v1660_v61 }
 0x138   :  { %v718_v14 = vmax.f32 %v505_v13, 0.0 }
 0x139   :  { %v1692_v16 = vpop.f32.mrf.mxu2  ;;  %v1694_v44 = vpop.f32.mrf.mxu3 }
 0x13a   :  { %v1696_v31 = vpop.f32.mrf.mxu0  ;;  %v1698_v45 = vpop.f32.mrf.mxu1 }
 0x13d   :  { %855 = vmatmul.f32.gmra.mxu0 %v708_v39  ;;  %968 = vmatmul.f32.gmra.mxu1 %v709_v53  ;;  %v712_v39 = vmax.f32 %v276_v1, 0.0  ;;  %v713_v53 = vmax.f32 %v389_v4, 0.0 }
 0x13e   :  { %1081 = vmatmul.f32.gmra.mxu2 %v710_v0  ;;  %1194 = vmatmul.f32.gmra.mxu3 %v711_v60  ;;  %v715_v0 = vmax.f32 %v615_v56, 0.0  ;;  %v618_v60 = vadd.f32 %v1566_v19, %v1666_v52  ;;  %v508_v19 = vadd.f32 %v1572_v26, %v1664_v11  ;;  %v398_v26 = vadd.f32 %v1578_v29, %v1662_v10 }
 0x13f   :  { %v288_v29 = vadd.f32 %v1584_v34, %v1660_v61 }
 0x140   :  { %v722_v20 = vmax.f32 %v508_v19, 0.0 }
 0x141   :  { %v1708_v57 = vpop.f32.mrf.mxu2  ;;  %v1710_v62 = vpop.f32.mrf.mxu3 }
 0x142   :  { %v1712_v50 = vpop.f32.mrf.mxu0  ;;  %v1714_v63 = vpop.f32.mrf.mxu1 }
 0x145   :  { %858 = vmatmul.f32.gmra.mxu0 %v712_v39  ;;  %971 = vmatmul.f32.gmra.mxu1 %v713_v53  ;;  %v716_v39 = vmax.f32 %v279_v7, 0.0  ;;  %v717_v53 = vmax.f32 %v392_v12, 0.0 }
 0x146   :  { %1084 = vmatmul.f32.gmra.mxu2 %v714_v6  ;;  %1197 = vmatmul.f32.gmra.mxu3 %v715_v0  ;;  %v719_v6 = vmax.f32 %v618_v60, 0.0  ;;  %v621_v0 = vadd.f32 %v1574_v27, %v1666_v52  ;;  %v511_v27 = vadd.f32 %v1580_v32, %v1664_v11  ;;  %v401_v32 = vadd.f32 %v1586_v35, %v1662_v10 }
 0x147   :  { %v291_v35 = vadd.f32 %v1592_v42, %v1660_v61 }
 0x148   :  { %v726_v28 = vmax.f32 %v511_v27, 0.0 }
 0x149   :  { %v1724_v1 = vpop.f32.mrf.mxu2  ;;  %v1726_v4 = vpop.f32.mrf.mxu3 }
 0x14a   :  { %v1728_v5 = vpop.f32.mrf.mxu0  ;;  %v1730_v56 = vpop.f32.mrf.mxu1 }
 0x14d   :  { %861 = vmatmul.f32.gmra.mxu0 %v716_v39  ;;  %974 = vmatmul.f32.gmra.mxu1 %v717_v53  ;;  %v720_v39 = vmax.f32 %v282_v15, 0.0  ;;  %v721_v53 = vmax.f32 %v395_v18, 0.0 }
 0x14e   :  { %1087 = vmatmul.f32.gmra.mxu2 %v718_v14  ;;  %1200 = vmatmul.f32.gmra.mxu3 %v719_v6  ;;  %v723_v14 = vmax.f32 %v621_v0, 0.0  ;;  %v624_v6 = vadd.f32 %v1582_v33, %v1666_v52  ;;  %v514_v33 = vadd.f32 %v1588_v40, %v1664_v11  ;;  %v404_v40 = vadd.f32 %v1594_v43, %v1662_v10 }
 0x14f   :  { %v294_v43 = vadd.f32 %v1600_v48, %v1660_v61 }
 0x150   :  { %v730_v34 = vmax.f32 %v514_v33, 0.0 }
 0x151   :  { %v1740_v7 = vpop.f32.mrf.mxu2  ;;  %v1742_v12 = vpop.f32.mrf.mxu3 }
 0x152   :  { %v1744_v13 = vpop.f32.mrf.mxu0  ;;  %v1746_v60 = vpop.f32.mrf.mxu1 }
 0x155   :  { %864 = vmatmul.f32.gmra.mxu0 %v720_v39  ;;  %977 = vmatmul.f32.gmra.mxu1 %v721_v53  ;;  %v724_v39 = vmax.f32 %v285_v21, 0.0  ;;  %v725_v53 = vmax.f32 %v398_v26, 0.0 }
 0x156   :  { %1090 = vmatmul.f32.gmra.mxu2 %v722_v20  ;;  %1203 = vmatmul.f32.gmra.mxu3 %v723_v14  ;;  %v727_v20 = vmax.f32 %v624_v6, 0.0  ;;  %v627_v14 = vadd.f32 %v1590_v41, %v1666_v52  ;;  %v517_v41 = vadd.f32 %v1596_v46, %v1664_v11  ;;  %v407_v46 = vadd.f32 %v1602_v49, %v1662_v10 }
 0x157   :  { %v297_v49 = vadd.f32 %v1608_v58, %v1660_v61 }
 0x158   :  { %v734_v42 = vmax.f32 %v517_v41, 0.0 }
 0x159   :  { %v1756_v15 = vpop.f32.mrf.mxu2  ;;  %v1758_v18 = vpop.f32.mrf.mxu3 }
 0x15a   :  { %v1760_v19 = vpop.f32.mrf.mxu0  ;;  %v1762_v0 = vpop.f32.mrf.mxu1 }
 0x15d   :  { %867 = vmatmul.f32.gmra.mxu0 %v724_v39  ;;  %980 = vmatmul.f32.gmra.mxu1 %v725_v53  ;;  %v728_v39 = vmax.f32 %v288_v29, 0.0  ;;  %v729_v53 = vmax.f32 %v401_v32, 0.0 }
 0x15e   :  { %1093 = vmatmul.f32.gmra.mxu2 %v726_v28  ;;  %1206 = vmatmul.f32.gmra.mxu3 %v727_v20  ;;  %v731_v28 = vmax.f32 %v627_v14, 0.0  ;;  %v630_v20 = vadd.f32 %v1598_v47, %v1666_v52  ;;  %v520_v47 = vadd.f32 %v1604_v54, %v1664_v11  ;;  %v410_v54 = vadd.f32 %v1610_v59, %v1662_v10 }
 0x15f   :  { %v300_v59 = vadd.f32 %v1616_v8, %v1660_v61 }
 0x160   :  { %v738_v48 = vmax.f32 %v520_v47, 0.0 }
 0x161   :  { %v1772_v21 = vpop.f32.mrf.mxu2  ;;  %v1774_v26 = vpop.f32.mrf.mxu3 }
 0x162   :  { %v1776_v27 = vpop.f32.mrf.mxu0  ;;  %v1778_v6 = vpop.f32.mrf.mxu1 }
 0x165   :  { %870 = vmatmul.f32.gmra.mxu0 %v728_v39  ;;  %983 = vmatmul.f32.gmra.mxu1 %v729_v53  ;;  %v732_v39 = vmax.f32 %v291_v35, 0.0  ;;  %v733_v53 = vmax.f32 %v404_v40, 0.0 }
 0x166   :  { %1096 = vmatmul.f32.gmra.mxu2 %v730_v34  ;;  %1209 = vmatmul.f32.gmra.mxu3 %v731_v28  ;;  %v735_v34 = vmax.f32 %v630_v20, 0.0  ;;  %v633_v28 = vadd.f32 %v1606_v55, %v1666_v52  ;;  %v523_v55 = vadd.f32 %v1612_v2, %v1664_v11  ;;  %v413_v2 = vadd.f32 %v1618_v9, %v1662_v10 }
 0x167   :  { %v303_v9 = vadd.f32 %v1624_v24, %v1660_v61 }
 0x168   :  { %v742_v58 = vmax.f32 %v523_v55, 0.0 }
 0x169   :  { %v1788_v29 = vpop.f32.mrf.mxu2  ;;  %v1790_v32 = vpop.f32.mrf.mxu3 }
 0x16a   :  { %v1792_v33 = vpop.f32.mrf.mxu0  ;;  %v1794_v14 = vpop.f32.mrf.mxu1 }
 0x16d   :  { %873 = vmatmul.f32.gmra.mxu0 %v732_v39  ;;  %986 = vmatmul.f32.gmra.mxu1 %v733_v53  ;;  %v736_v39 = vmax.f32 %v294_v43, 0.0  ;;  %v737_v53 = vmax.f32 %v407_v46, 0.0 }
 0x16e   :  { %1099 = vmatmul.f32.gmra.mxu2 %v734_v42  ;;  %1212 = vmatmul.f32.gmra.mxu3 %v735_v34  ;;  %v739_v42 = vmax.f32 %v633_v28, 0.0  ;;  %v636_v34 = vadd.f32 %v1614_v3, %v1666_v52  ;;  %v526_v3 = vadd.f32 %v1620_v22, %v1664_v11  ;;  %v416_v22 = vadd.f32 %v1626_v25, %v1662_v10 }
 0x16f   :  { %v306_v25 = vadd.f32 %v1632_v38, %v1660_v61 }
 0x170   :  { %v746_v8 = vmax.f32 %v526_v3, 0.0 }
 0x171   :  { %v1804_v35 = vpop.f32.mrf.mxu2  ;;  %v1806_v40 = vpop.f32.mrf.mxu3 }
 0x172   :  { %v1808_v41 = vpop.f32.mrf.mxu0  ;;  %v1810_v20 = vpop.f32.mrf.mxu1 }
 0x175   :  { %876 = vmatmul.f32.gmra.mxu0 %v736_v39  ;;  %989 = vmatmul.f32.gmra.mxu1 %v737_v53  ;;  %v740_v39 = vmax.f32 %v297_v49, 0.0  ;;  %v741_v53 = vmax.f32 %v410_v54, 0.0 }
 0x176   :  { %1102 = vmatmul.f32.gmra.mxu2 %v738_v48  ;;  %1215 = vmatmul.f32.gmra.mxu3 %v739_v42  ;;  %v743_v48 = vmax.f32 %v636_v34, 0.0  ;;  %v639_v42 = vadd.f32 %v1622_v23, %v1666_v52  ;;  %v529_v23 = vadd.f32 %v1628_v36, %v1664_v11  ;;  %v2122_v36 = vld [vmem:[#allocation15_spill] sm:$0xff] }
 0x178   :  { %v750_v24 = vmax.f32 %v529_v23, 0.0 }
 0x179   :  { %v1820_v43 = vpop.f32.mrf.mxu2  ;;  %v1822_v46 = vpop.f32.mrf.mxu3 }
 0x17a   :  { %v1824_v47 = vpop.f32.mrf.mxu0  ;;  %v1826_v28 = vpop.f32.mrf.mxu1 }
 0x17d   :  { %879 = vmatmul.f32.gmra.mxu0 %v740_v39  ;;  %992 = vmatmul.f32.gmra.mxu1 %v741_v53  ;;  %v744_v39 = vmax.f32 %v300_v59, 0.0  ;;  %v745_v53 = vmax.f32 %v413_v2, 0.0 }
 0x17e   :  { %1105 = vmatmul.f32.gmra.mxu2 %v742_v58  ;;  %1218 = vmatmul.f32.gmra.mxu3 %v743_v48  ;;  %v747_v58 = vmax.f32 %v639_v42, 0.0  ;;  %v642_v48 = vadd.f32 %v1630_v37, %v1666_v52  ;;  %v419_v37 = vadd.f32 %v2122_v36, %v1662_v10 }
 0x181   :  { %v1836_v49 = vpop.f32.mrf.mxu2  ;;  %v1838_v54 = vpop.f32.mrf.mxu3 }
 0x182   :  { %v1840_v55 = vpop.f32.mrf.mxu0  ;;  %v1842_v34 = vpop.f32.mrf.mxu1 }
 0x185   :  { %882 = vmatmul.f32.gmra.mxu0 %v744_v39  ;;  %995 = vmatmul.f32.gmra.mxu1 %v745_v53  ;;  %v748_v39 = vmax.f32 %v303_v9, 0.0  ;;  %v749_v53 = vmax.f32 %v416_v22, 0.0 }
 0x186   :  { %1108 = vmatmul.f32.gmra.mxu2 %v746_v8  ;;  %1221 = vmatmul.f32.gmra.mxu3 %v747_v58  ;;  %v751_v8 = vmax.f32 %v642_v48, 0.0  ;;  %v2123_v58 = vld [vmem:[#allocation16_spill] sm:$0xff] }
 0x189   :  { %v1852_v59 = vpop.f32.mrf.mxu2  ;;  %v1854_v2 = vpop.f32.mrf.mxu3 }
 0x18a   :  { %2119 = vst [vmem:[#allocation29_spill] sm:$0xff] %v1854_v2  ;;  %v1856_v3 = vpop.f32.mrf.mxu0  ;;  %v1858_v42 = vpop.f32.mrf.mxu1  ;;  %v532_v2 = vadd.f32 %v2123_v58, %v1664_v11 }
 0x18b   :  { %2120 = vst [vmem:[#allocation30_spill] sm:$0xff] %v1856_v3  ;;  %v2124_v3 = vld [vmem:[#allocation17_spill] sm:$0xff] }
 0x18c   :  { %2121 = vst [vmem:[#allocation31_spill] sm:$0xff] %v1858_v42  ;;  %v645_v42 = vadd.f32 %v2124_v3, %v1666_v52  ;;  %v754_v38 = vmax.f32 %v532_v2, 0.0  ;;  %v2130_v3 = vld [vmem:[#allocation19_spill] sm:$0xff] }
 0x18d   :  { %885 = vmatmul.f32.gmra.mxu0 %v748_v39  ;;  %998 = vmatmul.f32.gmra.mxu1 %v749_v53  ;;  %v752_v39 = vmax.f32 %v306_v25, 0.0  ;;  %v753_v53 = vmax.f32 %v419_v37, 0.0  ;;  %v422_v58 = vadd.f32 %v2130_v3, %v1662_v10 }
 0x18e   :  { %1111 = vmatmul.f32.gmra.mxu2 %v750_v24  ;;  %1224 = vmatmul.f32.gmra.mxu3 %v751_v8  ;;  %v755_v24 = vmax.f32 %v645_v42, 0.0  ;;  %v2129_v8 = vld [vmem:[#allocation18_spill] sm:$0xff] }
 0x18f   :  { %v309_v36 = vadd.f32 %v2129_v8, %v1660_v61 }
 0x191   :  { %v1868_v9 = vpop.f32.mrf.mxu2  ;;  %v1870_v22 = vpop.f32.mrf.mxu3 }
 0x192   :  { %2125 = vst [vmem:[#allocation15_spill] sm:$0xff] %v1868_v9  ;;  %v1872_v23 = vpop.f32.mrf.mxu0  ;;  %v1874_v48 = vpop.f32.mrf.mxu1 }
 0x193   :  { %2126 = vst [vmem:[#allocation16_spill] sm:$0xff] %v1870_v22  ;;  %v2131_v22 = vld [vmem:[#allocation20_spill] sm:$0xff] }
 0x194   :  { %2127 = vst [vmem:[#allocation17_spill] sm:$0xff] %v1872_v23  ;;  %v535_v9 = vadd.f32 %v2131_v22, %v1664_v11  ;;  %v2132_v23 = vld [vmem:[#allocation21_spill] sm:$0xff]  ;;  %v2137_v22 = vld [vmem:[#allocation22_spill] sm:$0xff] }
 0x195   :  { %2128 = vst [vmem:[#allocation32_spill] sm:$0xff] %v1874_v48  ;;  %888 = vmatmul.f32.gmra.mxu0 %v752_v39  ;;  %1001 = vmatmul.f32.gmra.mxu1 %v753_v53  ;;  %v648_v48 = vadd.f32 %v2132_v23, %v1666_v52  ;;  %v756_v39 = vmax.f32 %v309_v36, 0.0  ;;  %v757_v53 = vmax.f32 %v422_v58, 0.0  ;;  %v312_v8 = vadd.f32 %v2137_v22, %v1660_v61  ;;  %v2138_v23 = vld [vmem:[#allocation23_spill] sm:$0xff] }
 0x196   :  { %1114 = vmatmul.f32.gmra.mxu2 %v754_v38  ;;  %1227 = vmatmul.f32.gmra.mxu3 %v755_v24  ;;  %v758_v38 = vmax.f32 %v535_v9, 0.0  ;;  %v425_v3 = vadd.f32 %v2138_v23, %v1662_v10 }
 0x197   :  { %v759_v24 = vmax.f32 %v648_v48, 0.0 }
 0x199   :  { %v1884_v25 = vpop.f32.mrf.mxu2  ;;  %v1886_v2 = vpop.f32.mrf.mxu3 }
 0x19a   :  { %2133 = vst [vmem:[#allocation18_spill] sm:$0xff] %v1884_v25  ;;  %v1888_v42 = vpop.f32.mrf.mxu0  ;;  %v1890_v37 = vpop.f32.mrf.mxu1 }
 0x19b   :  { %2134 = vst [vmem:[#allocation19_spill] sm:$0xff] %v1886_v2  ;;  %v2139_v2 = vld [vmem:[#allocation24_spill] sm:$0xff] }
 0x19c   :  { %2135 = vst [vmem:[#allocation20_spill] sm:$0xff] %v1888_v42  ;;  %v538_v25 = vadd.f32 %v2139_v2, %v1664_v11  ;;  %v2140_v42 = vld [vmem:[#allocation25_spill] sm:$0xff]  ;;  %v2143_v2 = vld [vmem:[#allocation26_spill] sm:$0xff] }
 0x19d   :  { %2136 = vst [vmem:[#allocation21_spill] sm:$0xff] %v1890_v37  ;;  %891 = vmatmul.f32.gmra.mxu0 %v756_v39  ;;  %1004 = vmatmul.f32.gmra.mxu1 %v757_v53  ;;  %v651_v37 = vadd.f32 %v2140_v42, %v1666_v52  ;;  %v760_v39 = vmax.f32 %v312_v8, 0.0  ;;  %v761_v53 = vmax.f32 %v425_v3, 0.0  ;;  %v315_v22 = vadd.f32 %v2143_v2, %v1660_v61  ;;  %v2144_v42 = vld [vmem:[#allocation27_spill] sm:$0xff] }
 0x19e   :  { %1117 = vmatmul.f32.gmra.mxu2 %v758_v38  ;;  %1230 = vmatmul.f32.gmra.mxu3 %v759_v24  ;;  %v762_v38 = vmax.f32 %v538_v25, 0.0  ;;  %v428_v23 = vadd.f32 %v2144_v42, %v1662_v10  ;;  %v544_v42 = vadd.f32 %v1692_v16, %v1664_v11 }
 0x19f   :  { %v763_v24 = vmax.f32 %v651_v37, 0.0 }
 0x1a1   :  { %v1900_v36 = vpop.f32.mrf.mxu2  ;;  %v1902_v9 = vpop.f32.mrf.mxu3 }
 0x1a2   :  { %2141 = vst [vmem:[#allocation22_spill] sm:$0xff] %v1902_v9  ;;  %v1904_v48 = vpop.f32.mrf.mxu0  ;;  %v1906_v58 = vpop.f32.mrf.mxu1  ;;  %v541_v9 = vadd.f32 %v1676_v30, %v1664_v11  ;;  %v318_v30 = vadd.f32 %v1680_v51, %v1660_v61 }
 0x1a3   :  { %2142 = vst [vmem:[#allocation23_spill] sm:$0xff] %v1906_v58  ;;  %v654_v58 = vadd.f32 %v1678_v17, %v1666_v52  ;;  %v2148_v17 = vld [vmem:[#allocation28_spill] sm:$0xff] }
 0x1a4   :  { %v431_v2 = vadd.f32 %v2148_v17, %v1662_v10  ;;  %v434_v17 = vadd.f32 %v1698_v45, %v1662_v10  ;;  %v324_v45 = vadd.f32 %v1712_v50, %v1660_v61 }
 0x1a5   :  { %894 = vmatmul.f32.gmra.mxu0 %v760_v39  ;;  %1007 = vmatmul.f32.gmra.mxu1 %v761_v53  ;;  %v764_v39 = vmax.f32 %v315_v22, 0.0  ;;  %v765_v53 = vmax.f32 %v428_v23, 0.0 }
 0x1a6   :  { %1120 = vmatmul.f32.gmra.mxu2 %v762_v38  ;;  %1233 = vmatmul.f32.gmra.mxu3 %v763_v24  ;;  %v766_v38 = vmax.f32 %v541_v9, 0.0  ;;  %v767_v24 = vmax.f32 %v654_v58, 0.0  ;;  %v1935_v9 = vld [vmem:[%s2103_s4] ss:$0 sm:$0xff]  ;;  %s1487_s4 = smov [#allocation10]  }
 0x1a7   :  { %s1324_s15 = sshll.u32 %s1487_s4, 4  ;;  %s1325_s15 = int_to_ptr.vmem [resolvable:$true] %s1324_s15 }
 0x1a9   :  { %v1916_v8 = vpop.f32.mrf.mxu2  ;;  %v1918_v25 = vpop.f32.mrf.mxu3 }
 0x1aa   :  { %2145 = vst [vmem:[#allocation24_spill] sm:$0xff] %v1918_v25  ;;  %v1920_v37 = vpop.f32.mrf.mxu0  ;;  %v1922_v3 = vpop.f32.mrf.mxu1 }
 0x1ab   :  { %2146 = vst [vmem:[#allocation25_spill] sm:$0xff] %v1920_v37 }
 0x1ac   :  { %2147 = vst [vmem:[#allocation26_spill] sm:$0xff] %v1922_v3  ;;  %v657_v3 = vadd.f32 %v1694_v44, %v1666_v52  ;;  %v321_v44 = vadd.f32 %v1696_v31, %v1660_v61 }
 0x1ad   :  { %897 = vmatmul.f32.gmra.mxu0 %v764_v39  ;;  %1010 = vmatmul.f32.gmra.mxu1 %v765_v53  ;;  %v768_v39 = vmax.f32 %v318_v30, 0.0  ;;  %v769_v53 = vmax.f32 %v431_v2, 0.0  ;;  %v660_v30 = vadd.f32 %v1710_v62, %v1666_v52  ;;  %v550_v62 = vadd.f32 %v1724_v1, %v1664_v11 }
 0x1ae   :  { %1123 = vmatmul.f32.gmra.mxu2 %v766_v38  ;;  %1236 = vmatmul.f32.gmra.mxu3 %v767_v24  ;;  %v770_v38 = vmax.f32 %v544_v42, 0.0  ;;  %v771_v24 = vmax.f32 %v657_v3, 0.0  ;;  %v440_v1 = vadd.f32 %v1730_v56, %v1662_v10  ;;  %v330_v56 = vadd.f32 %v1744_v13, %v1660_v61 }
 0x1af   :  { %v775_v37 = vmax.f32 %v660_v30, 0.0 }
 0x1b1   :  { %v1937_v58 = vpop.f32.mrf.mxu2  ;;  %v1939_v22 = vpop.f32.mrf.mxu3 }
 0x1b2   :  { %2149 = vst [vmem:[#allocation27_spill] sm:$0xff] %v1937_v58  ;;  %v853_v23 = vpop.f32.mrf.mxu0  ;;  %v966_v51 = vpop.f32.mrf.mxu1 }
 0x1b3   :  { %2150 = vst [vmem:[#allocation28_spill] sm:$0xff] %v1939_v22  ;;  %v854_v16 = vadd.f32 %v1935_v9, %v853_v23  ;;  %v547_v22 = vadd.f32 %v1708_v57, %v1664_v11  ;;  %v437_v57 = vadd.f32 %v1714_v63, %v1662_v10  ;;  %v327_v63 = vadd.f32 %v1728_v5, %v1660_v61 }
 0x1b5   :  { %900 = vmatmul.f32.gmra.mxu0 %v768_v39  ;;  %1013 = vmatmul.f32.gmra.mxu1 %v769_v53  ;;  %v967_v2 = vadd.f32 %v966_v51, %v854_v16  ;;  %v774_v58 = vmax.f32 %v547_v22, 0.0  ;;  %v663_v22 = vadd.f32 %v1726_v4, %v1666_v52  ;;  %v553_v4 = vadd.f32 %v1740_v7, %v1664_v11 }
 0x1b6   :  { %1126 = vmatmul.f32.gmra.mxu2 %v770_v38  ;;  %1239 = vmatmul.f32.gmra.mxu3 %v771_v24  ;;  %v772_v38 = vmax.f32 %v321_v44, 0.0  ;;  %v773_v24 = vmax.f32 %v434_v17, 0.0  ;;  %v443_v7 = vadd.f32 %v1746_v60, %v1662_v10  ;;  %v333_v60 = vadd.f32 %v1760_v19, %v1660_v61 }
 0x1b9   :  { %v1079_v3 = vpop.f32.mrf.mxu2  ;;  %v1192_v42 = vpop.f32.mrf.mxu3 }
 0x1ba   :  { %v1080_v23 = vadd.f32 %v1079_v3, %v967_v2  ;;  %v856_v39 = vpop.f32.mrf.mxu0  ;;  %v969_v53 = vpop.f32.mrf.mxu1  ;;  %v778_v3 = vmax.f32 %v550_v62, 0.0  ;;  %v781_v62 = vmax.f32 %v440_v1, 0.0 }
 0x1bb   :  { %v857_v25 = vadd.f32 %v1935_v9, %v856_v39 }
 0x1bc   :  { %v1193_v31 = vadd.f32 %v1192_v42, %v1080_v23  ;;  %v779_v42 = vmax.f32 %v663_v22, 0.0  ;;  %v782_v22 = vmax.f32 %v553_v4, 0.0  ;;  %v672_v4 = vadd.f32 %v1774_v26, %v1666_v52 }
 0x1bd   :  { %903 = vmatmul.f32.gmra.mxu0 %v772_v38  ;;  %1016 = vmatmul.f32.gmra.mxu1 %v773_v24  ;;  %v970_v51 = vadd.f32 %v969_v53, %v857_v25  ;;  %v666_v25 = vadd.f32 %v1742_v12, %v1666_v52  ;;  %v556_v12 = vadd.f32 %v1756_v15, %v1664_v11 }
 0x1be   :  { %1288 = vst [vmem:[#allocation10] sm:$0xff] %v1193_v31  ;;  %1129 = vmatmul.f32.gmra.mxu2 %v774_v58  ;;  %1242 = vmatmul.f32.gmra.mxu3 %v775_v37  ;;  %v776_v58 = vmax.f32 %v324_v45, 0.0  ;;  %v777_v37 = vmax.f32 %v437_v57, 0.0  ;;  %v780_v57 = vmax.f32 %v327_v63, 0.0  ;;  %v446_v15 = vadd.f32 %v1762_v0, %v1662_v10 }
 0x1bf   :  { %v336_v0 = vadd.f32 %v1776_v27, %v1660_v61  ;;  %v562_v26 = vadd.f32 %v1788_v29, %v1664_v11  ;;  %v452_v29 = vadd.f32 %v1794_v14, %v1662_v10  ;;  %v342_v14 = vadd.f32 %v1808_v41, %v1660_v61 }
 0x1c1   :  { %v1082_v16 = vpop.f32.mrf.mxu2  ;;  %v1195_v44 = vpop.f32.mrf.mxu3 }
 0x1c2   :  { %v1083_v17 = vadd.f32 %v1082_v16, %v970_v51  ;;  %v859_v30 = vpop.f32.mrf.mxu0  ;;  %v972_v2 = vpop.f32.mrf.mxu1  ;;  %v783_v51 = vmax.f32 %v666_v25, 0.0 }
 0x1c3   :  { %v860_v23 = vadd.f32 %v1935_v9, %v859_v30 }
 0x1c4   :  { %v1196_v50 = vadd.f32 %v1195_v44, %v1083_v17  ;;  %v669_v44 = vadd.f32 %v1758_v18, %v1666_v52  ;;  %v559_v18 = vadd.f32 %v1772_v21, %v1664_v11  ;;  %v449_v21 = vadd.f32 %v1778_v6, %v1662_v10 }
 0x1c5   :  { %906 = vmatmul.f32.gmra.mxu0 %v776_v58  ;;  %1019 = vmatmul.f32.gmra.mxu1 %v777_v37  ;;  %v973_v39 = vadd.f32 %v972_v2, %v860_v23  ;;  %v786_v23 = vmax.f32 %v556_v12, 0.0  ;;  %v339_v6 = vadd.f32 %v1792_v33, %v1660_v61 }
 0x1c6   :  { %1289 = vst [vmem:[#allocation10 + $0x8] sm:$0xff] %v1196_v50  ;;  %1132 = vmatmul.f32.gmra.mxu2 %v778_v3  ;;  %1245 = vmatmul.f32.gmra.mxu3 %v779_v42  ;;  %v784_v42 = vmax.f32 %v330_v56, 0.0  ;;  %v785_v50 = vmax.f32 %v443_v7, 0.0  ;;  %v787_v63 = vmax.f32 %v669_v44, 0.0 }
 0x1c9   :  { %v1085_v53 = vpop.f32.mrf.mxu2  ;;  %v1198_v38 = vpop.f32.mrf.mxu3 }
 0x1ca   :  { %v1086_v24 = vadd.f32 %v1085_v53, %v973_v39  ;;  %v862_v31 = vpop.f32.mrf.mxu0  ;;  %v975_v45 = vpop.f32.mrf.mxu1 }
 0x1cb   :  { %v863_v16 = vadd.f32 %v1935_v9, %v862_v31 }
 0x1cc   :  { %v1199_v5 = vadd.f32 %v1198_v38, %v1086_v24 }
 0x1cd   :  { %909 = vmatmul.f32.gmra.mxu0 %v780_v57  ;;  %1022 = vmatmul.f32.gmra.mxu1 %v781_v62  ;;  %v976_v17 = vadd.f32 %v975_v45, %v863_v16  ;;  %v788_v45 = vmax.f32 %v333_v60, 0.0  ;;  %v789_v57 = vmax.f32 %v446_v15, 0.0  ;;  %v790_v62 = vmax.f32 %v559_v18, 0.0 }
 0x1ce   :  { %1290 = vst [vmem:[#allocation10 + $0x10] sm:$0xff] %v1199_v5  ;;  %1135 = vmatmul.f32.gmra.mxu2 %v782_v22  ;;  %1248 = vmatmul.f32.gmra.mxu3 %v783_v51  ;;  %v791_v22 = vmax.f32 %v672_v4, 0.0  ;;  %v675_v5 = vadd.f32 %v1790_v32, %v1666_v52  ;;  %v565_v32 = vadd.f32 %v1804_v35, %v1664_v11  ;;  %v796_v15 = vmax.f32 %v339_v6, 0.0 }
 0x1cf   :  { %v797_v18 = vmax.f32 %v452_v29, 0.0  ;;  %v455_v35 = vadd.f32 %v1810_v20, %v1662_v10  ;;  %v345_v20 = vadd.f32 %v1824_v47, %v1660_v61 }
 0x1d0   :  { %v798_v4 = vmax.f32 %v565_v32, 0.0 }
 0x1d1   :  { %v1088_v30 = vpop.f32.mrf.mxu2  ;;  %v1201_v2 = vpop.f32.mrf.mxu3 }
 0x1d2   :  { %v1089_v58 = vadd.f32 %v1088_v30, %v976_v17  ;;  %v865_v37 = vpop.f32.mrf.mxu0  ;;  %v978_v3 = vpop.f32.mrf.mxu1  ;;  %v792_v30 = vmax.f32 %v336_v0, 0.0 }
 0x1d3   :  { %v866_v1 = vadd.f32 %v1935_v9, %v865_v37  ;;  %v795_v37 = vmax.f32 %v675_v5, 0.0 }
 0x1d4   :  { %v1202_v13 = vadd.f32 %v1201_v2, %v1089_v58  ;;  %v793_v2 = vmax.f32 %v449_v21, 0.0  ;;  %v794_v58 = vmax.f32 %v562_v26, 0.0  ;;  %v684_v26 = vadd.f32 %v1838_v54, %v1666_v52 }
 0x1d5   :  { %912 = vmatmul.f32.gmra.mxu0 %v784_v42  ;;  %1025 = vmatmul.f32.gmra.mxu1 %v785_v50  ;;  %v979_v25 = vadd.f32 %v978_v3, %v866_v1  ;;  %v678_v42 = vadd.f32 %v1806_v40, %v1666_v52  ;;  %v568_v40 = vadd.f32 %v1820_v43, %v1664_v11 }
 0x1d6   :  { %1291 = vst [vmem:[#allocation10 + $0x18] sm:$0xff] %v1202_v13  ;;  %1138 = vmatmul.f32.gmra.mxu2 %v786_v23  ;;  %1251 = vmatmul.f32.gmra.mxu3 %v787_v63  ;;  %v458_v43 = vadd.f32 %v1826_v28, %v1662_v10  ;;  %v348_v28 = vadd.f32 %v1840_v55, %v1660_v61 }
 0x1d7   :  { %v574_v54 = vadd.f32 %v1852_v59, %v1664_v11 }
 0x1d9   :  { %v1091_v39 = vpop.f32.mrf.mxu2  ;;  %v1204_v53 = vpop.f32.mrf.mxu3 }
 0x1da   :  { %v1092_v38 = vadd.f32 %v1091_v39, %v979_v25  ;;  %v868_v24 = vpop.f32.mrf.mxu0  ;;  %v981_v31 = vpop.f32.mrf.mxu1  ;;  %v799_v25 = vmax.f32 %v678_v42, 0.0 }
 0x1db   :  { %v869_v51 = vadd.f32 %v1935_v9, %v868_v24 }
 0x1dc   :  { %v1205_v19 = vadd.f32 %v1204_v53, %v1092_v38  ;;  %v681_v53 = vadd.f32 %v1822_v46, %v1666_v52  ;;  %v571_v46 = vadd.f32 %v1836_v49, %v1664_v11  ;;  %v461_v49 = vadd.f32 %v1842_v34, %v1662_v10  ;;  %v2152_v34 = vld [vmem:[#allocation30_spill] sm:$0xff] }
 0x1dd   :  { %915 = vmatmul.f32.gmra.mxu0 %v788_v45  ;;  %1028 = vmatmul.f32.gmra.mxu1 %v789_v57  ;;  %v982_v16 = vadd.f32 %v981_v31, %v869_v51  ;;  %v802_v51 = vmax.f32 %v568_v40, 0.0  ;;  %v351_v59 = vadd.f32 %v2152_v34, %v1660_v61 }
 0x1de   :  { %1292 = vst [vmem:[#allocation10 + $0x20] sm:$0xff] %v1205_v19  ;;  %1141 = vmatmul.f32.gmra.mxu2 %v790_v62  ;;  %1254 = vmatmul.f32.gmra.mxu3 %v791_v22  ;;  %v800_v22 = vmax.f32 %v342_v14, 0.0  ;;  %v801_v19 = vmax.f32 %v455_v35, 0.0  ;;  %v803_v0 = vmax.f32 %v681_v53, 0.0 }
 0x1e1   :  { %v1094_v56 = vpop.f32.mrf.mxu2  ;;  %v1207_v7 = vpop.f32.mrf.mxu3 }
 0x1e2   :  { %v1095_v12 = vadd.f32 %v1094_v56, %v982_v16  ;;  %v871_v44 = vpop.f32.mrf.mxu0  ;;  %v984_v17 = vpop.f32.mrf.mxu1 }
 0x1e3   :  { %v872_v3 = vadd.f32 %v1935_v9, %v871_v44 }
 0x1e4   :  { %v1208_v27 = vadd.f32 %v1207_v7, %v1095_v12 }
 0x1e5   :  { %918 = vmatmul.f32.gmra.mxu0 %v792_v30  ;;  %1031 = vmatmul.f32.gmra.mxu1 %v793_v2  ;;  %v985_v50 = vadd.f32 %v984_v17, %v872_v3  ;;  %v804_v17 = vmax.f32 %v345_v20, 0.0  ;;  %v805_v30 = vmax.f32 %v458_v43, 0.0  ;;  %v806_v2 = vmax.f32 %v571_v46, 0.0  ;;  %v2158_v43 = vld [vmem:[#allocation18_spill] sm:$0xff] }
 0x1e6   :  { %1293 = vst [vmem:[#allocation10 + $0x28] sm:$0xff] %v1208_v27  ;;  %1144 = vmatmul.f32.gmra.mxu2 %v794_v58  ;;  %1257 = vmatmul.f32.gmra.mxu3 %v795_v37  ;;  %v807_v58 = vmax.f32 %v684_v26, 0.0  ;;  %v2151_v27 = vld [vmem:[#allocation29_spill] sm:$0xff]  ;;  %v580_v46 = vadd.f32 %v2158_v43, %v1664_v11  ;;  %v2159_v26 = vld [vmem:[#allocation19_spill] sm:$0xff]  ;;  %v2168_v43 = vld [vmem:[#allocation28_spill] sm:$0xff] }
 0x1e7   :  { %v687_v3 = vadd.f32 %v2151_v27, %v1666_v52  ;;  %v2161_v27 = vld [vmem:[#allocation21_spill] sm:$0xff] }
 0x1e9   :  { %v1097_v23 = vpop.f32.mrf.mxu2  ;;  %v1210_v63 = vpop.f32.mrf.mxu3 }
 0x1ea   :  { %v1098_v13 = vadd.f32 %v1097_v23, %v985_v50  ;;  %v874_v1 = vpop.f32.mrf.mxu0  ;;  %v987_v60 = vpop.f32.mrf.mxu1 }
 0x1eb   :  { %v875_v39 = vadd.f32 %v1935_v9, %v874_v1  ;;  %v810_v1 = vmax.f32 %v574_v54, 0.0 }
 0x1ec   :  { %v1211_v33 = vadd.f32 %v1210_v63, %v1098_v13  ;;  %v808_v63 = vmax.f32 %v348_v28, 0.0  ;;  %v809_v13 = vmax.f32 %v461_v49, 0.0  ;;  %v2160_v49 = vld [vmem:[#allocation20_spill] sm:$0xff] }
 0x1ed   :  { %921 = vmatmul.f32.gmra.mxu0 %v796_v15  ;;  %1034 = vmatmul.f32.gmra.mxu1 %v797_v18  ;;  %v988_v38 = vadd.f32 %v987_v60, %v875_v39  ;;  %v811_v60 = vmax.f32 %v687_v3, 0.0  ;;  %v2153_v18 = vld [vmem:[#allocation31_spill] sm:$0xff]  ;;  %v2155_v39 = vld [vmem:[#allocation16_spill] sm:$0xff]  ;;  %v357_v54 = vadd.f32 %v2160_v49, %v1660_v61  ;;  %v470_v3 = vadd.f32 %v2161_v27, %v1662_v10 }
 0x1ee   :  { %1294 = vst [vmem:[#allocation10 + $0x30] sm:$0xff] %v1211_v33  ;;  %1147 = vmatmul.f32.gmra.mxu2 %v798_v4  ;;  %1260 = vmatmul.f32.gmra.mxu3 %v799_v25  ;;  %v464_v4 = vadd.f32 %v2153_v18, %v1662_v10  ;;  %v2154_v25 = vld [vmem:[#allocation15_spill] sm:$0xff]  ;;  %v690_v14 = vadd.f32 %v2155_v39, %v1666_v52  ;;  %v2164_v39 = vld [vmem:[#allocation24_spill] sm:$0xff] }
 0x1ef   :  { %v577_v33 = vadd.f32 %v2154_v25, %v1664_v11 }
 0x1f1   :  { %v1100_v24 = vpop.f32.mrf.mxu2  ;;  %v1213_v31 = vpop.f32.mrf.mxu3 }
 0x1f2   :  { %v1101_v45 = vadd.f32 %v1100_v24, %v988_v38  ;;  %v877_v57 = vpop.f32.mrf.mxu0  ;;  %v990_v62 = vpop.f32.mrf.mxu1 }
 0x1f3   :  { %v878_v21 = vadd.f32 %v1935_v9, %v877_v57  ;;  %v813_v57 = vmax.f32 %v464_v4, 0.0  ;;  %v2163_v4 = vld [vmem:[#allocation23_spill] sm:$0xff] }
 0x1f4   :  { %v1214_v41 = vadd.f32 %v1213_v31, %v1101_v45  ;;  %v812_v45 = vmax.f32 %v351_v59, 0.0  ;;  %v473_v25 = vadd.f32 %v2163_v4, %v1662_v10 }
 0x1f5   :  { %924 = vmatmul.f32.gmra.mxu0 %v800_v22  ;;  %1037 = vmatmul.f32.gmra.mxu1 %v801_v19  ;;  %v991_v5 = vadd.f32 %v990_v62, %v878_v21  ;;  %v814_v62 = vmax.f32 %v577_v33, 0.0  ;;  %v815_v22 = vmax.f32 %v690_v14, 0.0  ;;  %v2157_v21 = vld [vmem:[#allocation32_spill] sm:$0xff]  ;;  %v586_v33 = vadd.f32 %v1916_v8, %v1664_v11  ;;  %v2165_v8 = vld [vmem:[#allocation25_spill] sm:$0xff] }
 0x1f6   :  { %1295 = vst [vmem:[#allocation10 + $0x38] sm:$0xff] %v1214_v41  ;;  %1150 = vmatmul.f32.gmra.mxu2 %v802_v51  ;;  %1263 = vmatmul.f32.gmra.mxu3 %v803_v0  ;;  %v2156_v0 = vld [vmem:[#allocation17_spill] sm:$0xff]  ;;  %v467_v20 = vadd.f32 %v2157_v21, %v1662_v10  ;;  %v699_v14 = vadd.f32 %v2164_v39, %v1666_v52  ;;  %v2167_v21 = vld [vmem:[#allocation27_spill] sm:$0xff] }
 0x1f7   :  { %v354_v41 = vadd.f32 %v2156_v0, %v1660_v61  ;;  %v2166_v0 = vld [vmem:[#allocation26_spill] sm:$0xff] }
 0x1f9   :  { %v1103_v16 = vpop.f32.mrf.mxu2  ;;  %v1216_v56 = vpop.f32.mrf.mxu3 }
 0x1fa   :  { %v1104_v7 = vadd.f32 %v1103_v16, %v991_v5  ;;  %v880_v12 = vpop.f32.mrf.mxu0  ;;  %v993_v44 = vpop.f32.mrf.mxu1  ;;  %v693_v5 = vadd.f32 %v2159_v26, %v1666_v52 }
 0x1fb   :  { %v881_v37 = vadd.f32 %v1935_v9, %v880_v12 }
 0x1fc   :  { %v1217_v47 = vadd.f32 %v1216_v56, %v1104_v7 }
 0x1fd   :  { %927 = vmatmul.f32.gmra.mxu0 %v804_v17  ;;  %1040 = vmatmul.f32.gmra.mxu1 %v805_v30  ;;  %v994_v6 = vadd.f32 %v993_v44, %v881_v37  ;;  %v816_v30 = vmax.f32 %v354_v41, 0.0  ;;  %v476_v41 = vadd.f32 %v2166_v0, %v1662_v10 }
 0x1fe   :  { %1296 = vst [vmem:[#allocation10 + $0x40] sm:$0xff] %v1217_v47  ;;  %1153 = vmatmul.f32.gmra.mxu2 %v806_v2  ;;  %1266 = vmatmul.f32.gmra.mxu3 %v807_v58  ;;  %v817_v2 = vmax.f32 %v467_v20, 0.0  ;;  %v818_v58 = vmax.f32 %v580_v46, 0.0  ;;  %v819_v47 = vmax.f32 %v693_v5, 0.0  ;;  %v589_v20 = vadd.f32 %v2167_v21, %v1664_v11 }
 0x1ff   :  { %v702_v46 = vadd.f32 %v2168_v43, %v1666_v52 }
 0x201   :  { %v1106_v29 = vpop.f32.mrf.mxu2  ;;  %v1219_v32 = vpop.f32.mrf.mxu3 }
 0x202   :  { %v1107_v42 = vadd.f32 %v1106_v29, %v994_v6  ;;  %v883_v50 = vpop.f32.mrf.mxu0  ;;  %v996_v23 = vpop.f32.mrf.mxu1  ;;  %v583_v6 = vadd.f32 %v1900_v36, %v1664_v11  ;;  %v2162_v29 = vld [vmem:[#allocation22_spill] sm:$0xff]  ;;  %v360_v36 = vadd.f32 %v1904_v48, %v1660_v61 }
 0x203   :  { %v884_v15 = vadd.f32 %v1935_v9, %v883_v50 }
 0x204   :  { %v1220_v55 = vadd.f32 %v1219_v32, %v1107_v42  ;;  %v696_v32 = vadd.f32 %v2162_v29, %v1666_v52 }
 0x205   :  { %930 = vmatmul.f32.gmra.mxu0 %v808_v63  ;;  %1043 = vmatmul.f32.gmra.mxu1 %v809_v13  ;;  %v997_v35 = vadd.f32 %v996_v23, %v884_v15  ;;  %v822_v15 = vmax.f32 %v583_v6, 0.0 }
 0x206   :  { %1297 = vst [vmem:[#allocation10 + $0x48] sm:$0xff] %v1220_v55  ;;  %1156 = vmatmul.f32.gmra.mxu2 %v810_v1  ;;  %1269 = vmatmul.f32.gmra.mxu3 %v811_v60  ;;  %v820_v60 = vmax.f32 %v357_v54, 0.0  ;;  %v821_v55 = vmax.f32 %v470_v3, 0.0  ;;  %v823_v34 = vmax.f32 %v696_v32, 0.0 }
 0x209   :  { %v1109_v40 = vpop.f32.mrf.mxu2  ;;  %v1222_v53 = vpop.f32.mrf.mxu3 }
 0x20a   :  { %v1110_v38 = vadd.f32 %v1109_v40, %v997_v35  ;;  %v886_v24 = vpop.f32.mrf.mxu0  ;;  %v999_v31 = vpop.f32.mrf.mxu1 }
 0x20b   :  { %v887_v51 = vadd.f32 %v1935_v9, %v886_v24 }
 0x20c   :  { %v1223_v19 = vadd.f32 %v1222_v53, %v1110_v38 }
 0x20d   :  { %933 = vmatmul.f32.gmra.mxu0 %v812_v45  ;;  %1046 = vmatmul.f32.gmra.mxu1 %v813_v57  ;;  %v1000_v16 = vadd.f32 %v999_v31, %v887_v51  ;;  %v824_v45 = vmax.f32 %v360_v36, 0.0  ;;  %v825_v57 = vmax.f32 %v473_v25, 0.0  ;;  %v363_v51 = vadd.f32 %v2165_v8, %v1660_v61 }
 0x20e   :  { %1298 = vst [vmem:[#allocation10 + $0x50] sm:$0xff] %v1223_v19  ;;  %1159 = vmatmul.f32.gmra.mxu2 %v814_v62  ;;  %1272 = vmatmul.f32.gmra.mxu3 %v815_v22  ;;  %v826_v62 = vmax.f32 %v586_v33, 0.0  ;;  %v827_v22 = vmax.f32 %v699_v14, 0.0 }
 0x211   :  { %v1112_v56 = vpop.f32.mrf.mxu2  ;;  %v1225_v7 = vpop.f32.mrf.mxu3 }
 0x212   :  { %v1113_v12 = vadd.f32 %v1112_v56, %v1000_v16  ;;  %v889_v44 = vpop.f32.mrf.mxu0  ;;  %v1002_v17 = vpop.f32.mrf.mxu1 }
 0x213   :  { %v890_v28 = vadd.f32 %v1935_v9, %v889_v44  ;;  %v828_v44 = vmax.f32 %v363_v51, 0.0 }
 0x214   :  { %v1226_v37 = vadd.f32 %v1225_v7, %v1113_v12 }
 0x215   :  { %936 = vmatmul.f32.gmra.mxu0 %v816_v30  ;;  %1049 = vmatmul.f32.gmra.mxu1 %v817_v2  ;;  %v1003_v42 = vadd.f32 %v1002_v17, %v890_v28  ;;  %v829_v17 = vmax.f32 %v476_v41, 0.0  ;;  %v830_v30 = vmax.f32 %v589_v20, 0.0  ;;  %v831_v2 = vmax.f32 %v702_v46, 0.0 }
 0x216   :  { %1299 = vst [vmem:[#allocation10 + $0x58] sm:$0xff] %v1226_v37  ;;  %1162 = vmatmul.f32.gmra.mxu2 %v818_v58  ;;  %1275 = vmatmul.f32.gmra.mxu3 %v819_v47 }
 0x219   :  { %v1115_v50 = vpop.f32.mrf.mxu2  ;;  %v1228_v23 = vpop.f32.mrf.mxu3 }
 0x21a   :  { %v1116_v63 = vadd.f32 %v1115_v50, %v1003_v42  ;;  %v892_v13 = vpop.f32.mrf.mxu0  ;;  %v1005_v1 = vpop.f32.mrf.mxu1 }
 0x21b   :  { %v893_v18 = vadd.f32 %v1935_v9, %v892_v13 }
 0x21c   :  { %v1229_v59 = vadd.f32 %v1228_v23, %v1116_v63 }
 0x21d   :  { %939 = vmatmul.f32.gmra.mxu0 %v820_v60  ;;  %1052 = vmatmul.f32.gmra.mxu1 %v821_v55  ;;  %v1006_v35 = vadd.f32 %v1005_v1, %v893_v18 }
 0x21e   :  { %1300 = vst [vmem:[#allocation10 + $0x60] sm:$0xff] %v1229_v59  ;;  %1165 = vmatmul.f32.gmra.mxu2 %v822_v15  ;;  %1278 = vmatmul.f32.gmra.mxu3 %v823_v34 }
 0x221   :  { %v1118_v40 = vpop.f32.mrf.mxu2  ;;  %v1231_v53 = vpop.f32.mrf.mxu3 }
 0x222   :  { %v1119_v38 = vadd.f32 %v1118_v40, %v1006_v35  ;;  %v895_v24 = vpop.f32.mrf.mxu0  ;;  %v1008_v31 = vpop.f32.mrf.mxu1 }
 0x223   :  { %v896_v19 = vadd.f32 %v1935_v9, %v895_v24 }
 0x224   :  { %v1232_v48 = vadd.f32 %v1231_v53, %v1119_v38 }
 0x225   :  { %942 = vmatmul.f32.gmra.mxu0 %v824_v45  ;;  %1055 = vmatmul.f32.gmra.mxu1 %v825_v57  ;;  %v1009_v26 = vadd.f32 %v1008_v31, %v896_v19 }
 0x226   :  { %1301 = vst [vmem:[#allocation10 + $0x68] sm:$0xff] %v1232_v48  ;;  %1168 = vmatmul.f32.gmra.mxu2 %v826_v62  ;;  %1281 = vmatmul.f32.gmra.mxu3 %v827_v22 }
 0x229   :  { %v1121_v5 = vpop.f32.mrf.mxu2  ;;  %v1234_v16 = vpop.f32.mrf.mxu3 }
 0x22a   :  { %v1122_v56 = vadd.f32 %v1121_v5, %v1009_v26  ;;  %v898_v7 = vpop.f32.mrf.mxu0  ;;  %v1011_v12 = vpop.f32.mrf.mxu1 }
 0x22b   :  { %v899_v58 = vadd.f32 %v1935_v9, %v898_v7 }
 0x22c   :  { %v1235_v61 = vadd.f32 %v1234_v16, %v1122_v56 }
 0x22d   :  { %945 = vmatmul.f32.gmra.mxu0 %v828_v44  ;;  %1058 = vmatmul.f32.gmra.mxu1 %v829_v17  ;;  %v1012_v10 = vadd.f32 %v1011_v12, %v899_v58 }
 0x22e   :  { %1302 = vst [vmem:[#allocation10 + $0x70] sm:$0xff] %v1235_v61  ;;  %1171 = vmatmul.f32.gmra.mxu2 %v830_v30  ;;  %1284 = vmatmul.f32.gmra.mxu3 %v831_v2 }
 0x231   :  { %v1124_v52 = vpop.f32.mrf.mxu2  ;;  %v1237_v11 = vpop.f32.mrf.mxu3 }
 0x232   :  { %v1125_v47 = vadd.f32 %v1124_v52, %v1012_v10  ;;  %v901_v37 = vpop.f32.mrf.mxu0  ;;  %v1014_v28 = vpop.f32.mrf.mxu1 }
 0x233   :  { %v902_v54 = vadd.f32 %v1935_v9, %v901_v37 }
 0x234   :  { %v1238_v49 = vadd.f32 %v1237_v11, %v1125_v47 }
 0x235   :  { %v1015_v27 = vadd.f32 %v1014_v28, %v902_v54 }
 0x236   :  { %1303 = vst [vmem:[#allocation10 + $0x78] sm:$0xff] %v1238_v49 }
 0x239   :  { %v1127_v3 = vpop.f32.mrf.mxu2  ;;  %v1240_v6 = vpop.f32.mrf.mxu3 }
 0x23a   :  { %v1128_v29 = vadd.f32 %v1127_v3, %v1015_v27  ;;  %v904_v32 = vpop.f32.mrf.mxu0  ;;  %v1017_v42 = vpop.f32.mrf.mxu1 }
 0x23b   :  { %v905_v23 = vadd.f32 %v1935_v9, %v904_v32 }
 0x23c   :  { %v1241_v50 = vadd.f32 %v1240_v6, %v1128_v29 }
 0x23d   :  { %v1018_v63 = vadd.f32 %v1017_v42, %v905_v23 }
 0x23e   :  { %1304 = vst [vmem:[#allocation10 + $0x80] sm:$0xff] %v1241_v50 }
 0x241   :  { %v1130_v13 = vpop.f32.mrf.mxu2  ;;  %v1243_v1 = vpop.f32.mrf.mxu3 }
 0x242   :  { %v1131_v60 = vadd.f32 %v1130_v13, %v1018_v63  ;;  %v907_v55 = vpop.f32.mrf.mxu0  ;;  %v1020_v15 = vpop.f32.mrf.mxu1 }
 0x243   :  { %v908_v59 = vadd.f32 %v1935_v9, %v907_v55 }
 0x244   :  { %v1244_v34 = vadd.f32 %v1243_v1, %v1131_v60 }
 0x245   :  { %v1021_v18 = vadd.f32 %v1020_v15, %v908_v59 }
 0x246   :  { %1305 = vst [vmem:[#allocation10 + $0x88] sm:$0xff] %v1244_v34 }
 0x249   :  { %v1133_v36 = vpop.f32.mrf.mxu2  ;;  %v1246_v4 = vpop.f32.mrf.mxu3 }
 0x24a   :  { %v1134_v25 = vadd.f32 %v1133_v36, %v1021_v18  ;;  %v910_v33 = vpop.f32.mrf.mxu0  ;;  %v1023_v39 = vpop.f32.mrf.mxu1 }
 0x24b   :  { %v911_v35 = vadd.f32 %v1935_v9, %v910_v33 }
 0x24c   :  { %v1247_v14 = vadd.f32 %v1246_v4, %v1134_v25 }
 0x24d   :  { %v1024_v40 = vadd.f32 %v1023_v39, %v911_v35 }
 0x24e   :  { %1306 = vst [vmem:[#allocation10 + $0x90] sm:$0xff] %v1247_v14 }
 0x251   :  { %v1136_v53 = vpop.f32.mrf.mxu2  ;;  %v1249_v38 = vpop.f32.mrf.mxu3 }
 0x252   :  { %v1137_v24 = vadd.f32 %v1136_v53, %v1024_v40  ;;  %v913_v31 = vpop.f32.mrf.mxu0  ;;  %v1026_v45 = vpop.f32.mrf.mxu1 }
 0x253   :  { %v914_v62 = vadd.f32 %v1935_v9, %v913_v31 }
 0x254   :  { %v1250_v57 = vadd.f32 %v1249_v38, %v1137_v24 }
 0x255   :  { %v1027_v22 = vadd.f32 %v1026_v45, %v914_v62 }
 0x256   :  { %1307 = vst [vmem:[#allocation10 + $0x98] sm:$0xff] %v1250_v57 }
 0x259   :  { %v1139_v48 = vpop.f32.mrf.mxu2  ;;  %v1252_v19 = vpop.f32.mrf.mxu3 }
 0x25a   :  { %v1140_v8 = vadd.f32 %v1139_v48, %v1027_v22  ;;  %v916_v51 = vpop.f32.mrf.mxu0  ;;  %v1029_v0 = vpop.f32.mrf.mxu1 }
 0x25b   :  { %v917_v21 = vadd.f32 %v1935_v9, %v916_v51 }
 0x25c   :  { %v1253_v41 = vadd.f32 %v1252_v19, %v1140_v8 }
 0x25d   :  { %v1030_v20 = vadd.f32 %v1029_v0, %v917_v21 }
 0x25e   :  { %1308 = vst [vmem:[#allocation10 + $0xa0] sm:$0xff] %v1253_v41 }
 0x261   :  { %v1142_v43 = vpop.f32.mrf.mxu2  ;;  %v1255_v46 = vpop.f32.mrf.mxu3 }
 0x262   :  { %v1143_v26 = vadd.f32 %v1142_v43, %v1030_v20  ;;  %v919_v5 = vpop.f32.mrf.mxu0  ;;  %v1032_v16 = vpop.f32.mrf.mxu1 }
 0x263   :  { %v920_v7 = vadd.f32 %v1935_v9, %v919_v5 }
 0x264   :  { %v1256_v56 = vadd.f32 %v1255_v46, %v1143_v26 }
 0x265   :  { %v1033_v12 = vadd.f32 %v1032_v16, %v920_v7 }
 0x266   :  { %1309 = vst [vmem:[#allocation10 + $0xa8] sm:$0xff] %v1256_v56 }
 0x269   :  { %v1145_v44 = vpop.f32.mrf.mxu2  ;;  %v1258_v17 = vpop.f32.mrf.mxu3 }
 0x26a   :  { %v1146_v30 = vadd.f32 %v1145_v44, %v1033_v12  ;;  %v922_v2 = vpop.f32.mrf.mxu0  ;;  %v1035_v61 = vpop.f32.mrf.mxu1 }
 0x26b   :  { %v923_v10 = vadd.f32 %v1935_v9, %v922_v2 }
 0x26c   :  { %v1259_v58 = vadd.f32 %v1258_v17, %v1146_v30 }
 0x26d   :  { %v1036_v52 = vadd.f32 %v1035_v61, %v923_v10 }
 0x26e   :  { %1310 = vst [vmem:[#allocation10 + $0xb0] sm:$0xff] %v1259_v58 }
 0x271   :  { %v1148_v11 = vpop.f32.mrf.mxu2  ;;  %v1261_v47 = vpop.f32.mrf.mxu3 }
 0x272   :  { %v1149_v37 = vadd.f32 %v1148_v11, %v1036_v52  ;;  %v925_v28 = vpop.f32.mrf.mxu0  ;;  %v1038_v49 = vpop.f32.mrf.mxu1 }
 0x273   :  { %v926_v27 = vadd.f32 %v1935_v9, %v925_v28 }
 0x274   :  { %v1262_v54 = vadd.f32 %v1261_v47, %v1149_v37 }
 0x275   :  { %v1039_v3 = vadd.f32 %v1038_v49, %v926_v27 }
 0x276   :  { %1311 = vst [vmem:[#allocation10 + $0xb8] sm:$0xff] %v1262_v54 }
 0x279   :  { %v1151_v6 = vpop.f32.mrf.mxu2  ;;  %v1264_v29 = vpop.f32.mrf.mxu3 }
 0x27a   :  { %v1152_v32 = vadd.f32 %v1151_v6, %v1039_v3  ;;  %v928_v42 = vpop.f32.mrf.mxu0  ;;  %v1041_v50 = vpop.f32.mrf.mxu1 }
 0x27b   :  { %v929_v63 = vadd.f32 %v1935_v9, %v928_v42 }
 0x27c   :  { %v1265_v23 = vadd.f32 %v1264_v29, %v1152_v32 }
 0x27d   :  { %v1042_v13 = vadd.f32 %v1041_v50, %v929_v63 }
 0x27e   :  { %1312 = vst [vmem:[#allocation10 + $0xc0] sm:$0xff] %v1265_v23 }
 0x281   :  { %v1154_v1 = vpop.f32.mrf.mxu2  ;;  %v1267_v60 = vpop.f32.mrf.mxu3 }
 0x282   :  { %v1155_v55 = vadd.f32 %v1154_v1, %v1042_v13  ;;  %v931_v15 = vpop.f32.mrf.mxu0  ;;  %v1044_v34 = vpop.f32.mrf.mxu1 }
 0x283   :  { %v932_v18 = vadd.f32 %v1935_v9, %v931_v15 }
 0x284   :  { %v1268_v59 = vadd.f32 %v1267_v60, %v1155_v55 }
 0x285   :  { %v1045_v36 = vadd.f32 %v1044_v34, %v932_v18 }
 0x286   :  { %1313 = vst [vmem:[#allocation10 + $0xc8] sm:$0xff] %v1268_v59 }
 0x289   :  { %v1157_v4 = vpop.f32.mrf.mxu2  ;;  %v1270_v25 = vpop.f32.mrf.mxu3 }
 0x28a   :  { %v1158_v33 = vadd.f32 %v1157_v4, %v1045_v36  ;;  %v934_v39 = vpop.f32.mrf.mxu0  ;;  %v1047_v14 = vpop.f32.mrf.mxu1 }
 0x28b   :  { %v935_v40 = vadd.f32 %v1935_v9, %v934_v39 }
 0x28c   :  { %v1271_v35 = vadd.f32 %v1270_v25, %v1158_v33 }
 0x28d   :  { %v1048_v53 = vadd.f32 %v1047_v14, %v935_v40 }
 0x28e   :  { %1314 = vst [vmem:[#allocation10 + $0xd0] sm:$0xff] %v1271_v35 }
 0x291   :  { %v1160_v38 = vpop.f32.mrf.mxu2  ;;  %v1273_v24 = vpop.f32.mrf.mxu3 }
 0x292   :  { %v1161_v31 = vadd.f32 %v1160_v38, %v1048_v53  ;;  %v937_v45 = vpop.f32.mrf.mxu0  ;;  %v1050_v57 = vpop.f32.mrf.mxu1 }
 0x293   :  { %v938_v22 = vadd.f32 %v1935_v9, %v937_v45 }
 0x294   :  { %v1274_v62 = vadd.f32 %v1273_v24, %v1161_v31 }
 0x295   :  { %v1051_v48 = vadd.f32 %v1050_v57, %v938_v22 }
 0x296   :  { %1315 = vst [vmem:[#allocation10 + $0xd8] sm:$0xff] %v1274_v62 }
 0x299   :  { %v1163_v19 = vpop.f32.mrf.mxu2  ;;  %v1276_v8 = vpop.f32.mrf.mxu3 }
 0x29a   :  { %v1164_v51 = vadd.f32 %v1163_v19, %v1051_v48  ;;  %v940_v0 = vpop.f32.mrf.mxu0  ;;  %v1053_v41 = vpop.f32.mrf.mxu1 }
 0x29b   :  { %v941_v20 = vadd.f32 %v1935_v9, %v940_v0 }
 0x29c   :  { %v1277_v21 = vadd.f32 %v1276_v8, %v1164_v51 }
 0x29d   :  { %v1054_v43 = vadd.f32 %v1053_v41, %v941_v20 }
 0x29e   :  { %1316 = vst [vmem:[#allocation10 + $0xe0] sm:$0xff] %v1277_v21 }
 0x2a1   :  { %v1166_v46 = vpop.f32.mrf.mxu2  ;;  %v1279_v26 = vpop.f32.mrf.mxu3 }
 0x2a2   :  { %v1167_v5 = vadd.f32 %v1166_v46, %v1054_v43  ;;  %v943_v16 = vpop.f32.mrf.mxu0  ;;  %v1056_v12 = vpop.f32.mrf.mxu1 }
 0x2a3   :  { %v944_v7 = vadd.f32 %v1935_v9, %v943_v16 }
 0x2a4   :  { %v1280_v56 = vadd.f32 %v1279_v26, %v1167_v5 }
 0x2a5   :  { %v1057_v44 = vadd.f32 %v1056_v12, %v944_v7 }
 0x2a6   :  { %1317 = vst [vmem:[#allocation10 + $0xe8] sm:$0xff] %v1280_v56 }
 0x2a9   :  { %v1169_v17 = vpop.f32.mrf.mxu2  ;;  %v1282_v30 = vpop.f32.mrf.mxu3 }
 0x2aa   :  { %v1170_v2 = vadd.f32 %v1169_v17, %v1057_v44  ;;  %v946_v61 = vpop.f32.mrf.mxu0  ;;  %v1059_v52 = vpop.f32.mrf.mxu1 }
 0x2ab   :  { %v947_v10 = vadd.f32 %v1935_v9, %v946_v61 }
 0x2ac   :  { %v1283_v58 = vadd.f32 %v1282_v30, %v1170_v2 }
 0x2ad   :  { %v1060_v11 = vadd.f32 %v1059_v52, %v947_v10 }
 0x2ae   :  { %1318 = vst [vmem:[#allocation10 + $0xf0] sm:$0xff] %v1283_v58 }
 0x2b1   :  { %v1172_v47 = vpop.f32.mrf.mxu2  ;;  %v1285_v28 = vpop.f32.mrf.mxu3 }
 0x2b2   :  { %v1173_v37 = vadd.f32 %v1172_v47, %v1060_v11 }
 0x2b4   :  { %v1286_v49 = vadd.f32 %v1285_v28, %v1173_v37 }
 0x2b6   :  { %1319 = vst [vmem:[#allocation10 + $0xf8] sm:$0xff] %v1286_v49 }
 0x2b7   :  { %1332 = dma.vmem_to_hbm [thread:$0]  %s1325_s15, 4096, %s1327_s18, [#allocation4], %s1483_s30, %s1483_s30, %s1484_s6  }
 0x2b8   :  { %1477 = dma.done.wait [#allocation4], 4096  }
 0x2b9   :  { %1478 = vsyncadd [#allocation4], 4294963200 }
 0x2ba   :  { %1337 = vsyncpa [#allocation3], 1 }
 0x2bb   :  { %1338 = vsyncpa [#allocation6], 1 }
 0x2bc   :  { %1339 = vsyncpa [#allocation9], 1 }
 0x2bd   :  { %1340 = vsyncpa [#allocation4], 1 }

</bundles_post_ra>
